<compile_context>
chip_gen: v7x
topology: tpu7x:2x2x1
jax: 0.10.0
libtpu: 0.0.40
codegen_flags: <defaults>
</compile_context>

<pallas_src>
import functools
import math

import jax
import jax.numpy as jnp
from jax import lax
from jax.experimental import pallas as pl
from jax.experimental.pallas import tpu as pltpu


def _branch_kernel(src_ref, kv_ref, w_in_ref, b_in_ref,
                   wq_ref, bq_ref, wkv_ref, bkv_ref, wo_ref, bo_ref,
                   w_out_ref, o_ref, *, n_b, scale):
    """One grid step processes a tile of the block axis n (kv rows).

    src_ref  : (B, Ns, D)    resident across the whole grid
    kv_ref   : (B, tile, D)  current tile of the key/value feature
    w_in_ref : (tile, Ns)    rows of the seq-length Linear (seq_len_to_block / block_to_seq_len)
    w_out_ref: (tile, Ns)    rows of (seq_len_from_block / block_from_seq_len)^T
    o_ref    : (B, Ns, D)    f32 partial-sum block, resident across the arbitrary axis
    """
    kt = pl.program_id(1)                      # reduction step (arbitrary axis, innermost)
    tile = kv_ref.shape[1]
    d = wq_ref.shape[0]
    cdtype = src_ref.dtype                     # MXU operand dtype (input/compute dtype)

    w_in = w_in_ref[...]                       # (tile, Ns)
    b_in = b_in_ref[...]                       # (tile, 1)  f32
    wq = wq_ref[...]                           # (D, D)
    wkv = wkv_ref[...]                         # (D, 2D) = [Wk^T | Wv^T]
    wo = wo_ref[...]                           # (D, D)
    w_out_t = w_out_ref[...]                   # (tile, Ns)

    # ---- fused K/V in-projection: ONE (B*tile, D) @ (D, 2D) matmul -------------------
    # Merging the leading dims is layout-free (tile is a multiple of 8, D lane-dense).
    kv_flat = kv_ref[...].reshape(n_b * tile, d)
    kvp = jnp.dot(kv_flat, wkv, preferred_element_type=jnp.float32) + bkv_ref[...]
    # k of row-group c: kvp[c*tile:(c+1)*tile, :d] ; v: kvp[c*tile:(c+1)*tile, d:]

    # ---- query path: per-b seq-remap (tiny K=Ns matmuls), then ONE batched Wq matmul --
    q_in = jnp.concatenate(
        [jnp.dot(w_in, src_ref[b], preferred_element_type=jnp.float32) + b_in
         for b in range(n_b)], axis=0)                                   # (B*tile, D) f32
    q_all = (jnp.dot(q_in.astype(cdtype), wq, preferred_element_type=jnp.float32)
             + bq_ref[...]) * scale                                      # (B*tile, D) f32

    # ---- attention across PyTorch's dim 0 (batch_first=False => the "sequence") ------
    # One independent (n_b x n_b) softmax per block row n; n_b is small and static so this
    # is unrolled VPU/EUP/XLU work.  Scores -> softmax -> weighted V per b in one pass.
    ao_rows = []
    for b in range(n_b):
        q_b = q_all[b * tile:(b + 1) * tile, :]                          # (tile, D) f32
        s = [jnp.sum(q_b * kvp[c * tile:(c + 1) * tile, :d], axis=-1, keepdims=True)
             for c in range(n_b)]                                        # each (tile, 1)
        m = s[0]
        for c in range(1, n_b):
            m = jnp.maximum(m, s[c])
        e = [jnp.exp(s[c] - m) for c in range(n_b)]
        denom = e[0]
        for c in range(1, n_b):
            denom = denom + e[c]
        inv = pl.reciprocal(denom, approx=True)                          # EUP slot
        ao = (e[0] * inv) * kvp[0:tile, d:]
        for c in range(1, n_b):
            ao = ao + (e[c] * inv) * kvp[c * tile:(c + 1) * tile, d:]    # (tile, D) f32
        ao_rows.append(ao)

    # ---- ONE batched attention out-projection --------------------------------------
    ao_all = jnp.concatenate(ao_rows, axis=0).astype(cdtype)             # (B*tile, D)
    proj = jnp.dot(ao_all, wo, preferred_element_type=jnp.float32) + bo_ref[...]

    # ---- output Linear over the block axis n: contract tile rows, per b ------------
    contrib = jnp.stack(
        [lax.dot_general(w_out_t, proj[b * tile:(b + 1) * tile].astype(cdtype),
                         dimension_numbers=(((0,), (0,)), ((), ())),
                         preferred_element_type=jnp.float32)
         for b in range(n_b)], axis=0)                                   # (B, Ns, D) f32

    # Accumulate directly into the f32-resident output block (no scratch), single store.
    @pl.when(kt == 0)
    def _init():
        o_ref[...] = contrib

    @pl.when(kt != 0)
    def _acc():
        o_ref[...] = o_ref[...] + contrib


# -------------------------- wrapper helpers ---------------------------------------
def _vmem_budget():
    """Generation-aware VMEM limit + tile cap (128 MiB parts vs 64 MiB v7x-class)."""
    cap = None
    try:
        cap = pltpu.get_tpu_info().vmem_capacity_bytes
    except Exception:
        cap = None
    if cap is not None and cap >= 96 * 1024 * 1024:        # v5e / v6e: 128 MiB physical
        return 100 * 1024 * 1024, 1024
    return 48 * 1024 * 1024, 512                           # v7x (64 MiB) or unknown


def _detect_num_cores():
    """Best-effort TensorCores-per-chip query (v7x has 2); falls back to 1."""
    found = []
    try:
        info = pltpu.get_tpu_info()
        for name in ("num_cores", "tensorcores_per_chip", "num_tensorcores",
                     "cores_per_chip"):
            v = getattr(info, name, None)
            if isinstance(v, int) and v > 0:
                found.append(v)
    except Exception:
        pass
    try:
        v = getattr(jax.devices()[0], "num_cores", None)
        if isinstance(v, int) and v > 0:
            found.append(v)
    except Exception:
        pass
    return max(found) if found else 1


def _pick_block(n, requested, cap):
    """Tile along the block axis: a multiple of 8 (sublane) dividing n, or n itself."""
    if (requested is not None and 0 < requested <= n and n % requested == 0
            and (requested % 8 == 0 or requested == n)):
        return requested
    upper = (min(n, cap) // 8) * 8
    for t in range(upper, 0, -8):
        if n % t == 0:
            return t
    return n


def _pick_parallel_splits(num_tiles, requested):
    want = int(requested) if requested is not None else _detect_num_cores()
    p = max(1, min(want, num_tiles))
    while p > 1 and num_tiles % p != 0:
        p -= 1
    return p


def _attention_branch(src, kv, w_in, b_in, in_w, in_b, out_w, out_b,
                      w_out, b_out, *, block_n=None, parallel_splits=None,
                      compute_dtype=None):
    """One branch of TraditionalCrossAttention.

    src   : (B, Ns, D) feature whose seq axis is remapped (text for the text branch)
    kv    : (B, Nk, D) feature used as MHA key/value        (image for the text branch)
    w_in  : (Nk, Ns)   seq_len_to_block / block_to_seq_len weight, b_in (Nk,)
    in_w  : (3D, D)    nn.MultiheadAttention in_proj_weight, in_b (3D,)
    out_w : (D, D)     nn.MultiheadAttention out_proj weight, out_b (D,)
    w_out : (Ns, Nk)   seq_len_from_block / block_from_seq_len weight, b_out (Ns,)
    returns (B, Ns, D) in src.dtype
    """
    B, Ns, D = src.shape
    Bk, Nk, Dk = kv.shape
    assert Bk == B and Dk == D, "MHA kdim/vdim default to embed_dim -> dims must match"
    assert w_in.shape == (Nk, Ns) and w_out.shape == (Ns, Nk)
    assert in_w.shape == (3 * D, D)

    out_dtype = src.dtype
    cdtype = jnp.dtype(compute_dtype) if compute_dtype is not None else src.dtype
    f32 = jnp.float32

    vmem_limit, tile_cap = _vmem_budget()
    tile = _pick_block(Nk, block_n, tile_cap)
    num_tiles = Nk // tile
    P = _pick_parallel_splits(num_tiles, parallel_splits)
    KT = num_tiles // P

    # Wrapper-side layout plumbing (once per call): weights pre-transposed to (in, out),
    # K/V projection fused into one (D, 2D) weight, MXU operands cast to compute dtype,
    # biases kept in f32 and reshaped to broadcast along lanes/sublanes in-kernel.
    src_c = src.astype(cdtype)
    kv_c = kv.astype(cdtype)
    w_in_c = w_in.astype(cdtype)                    # (Nk, Ns), tiled along rows
    b_in_c = b_in.reshape(Nk, 1).astype(f32)
    wq_t = in_w[:D].T.astype(cdtype)                # (D, D)
    bq = in_b[:D].reshape(1, D).astype(f32)
    wkv_t = in_w[D:].T.astype(cdtype)               # (D, 2D) = [Wk^T | Wv^T]
    bkv = in_b[D:].reshape(1, 2 * D).astype(f32)
    wo_t = out_w.T.astype(cdtype)                   # (D, D)
    bo = out_b.reshape(1, D).astype(f32)
    w_out_t = w_out.T.astype(cdtype)                # (Nk, Ns), tiled along rows

    itemsize = jnp.dtype(cdtype).itemsize
    flops = 4 * B * Nk * Ns * D + 8 * B * Nk * D * D + 4 * Nk * B * B * D
    bytes_accessed = itemsize * (src.size + kv.size + w_in.size + w_out.size
                                 + in_w.size + out_w.size) \
        + 4 * (P * B * Ns * D + b_in.size + in_b.size + out_b.size + b_out.size)
    cost = pl.CostEstimate(flops=int(flops),
                           transcendentals=int(Nk * B * (B + 1)),
                           bytes_accessed=int(bytes_accessed))

    kernel = functools.partial(_branch_kernel, n_b=B, scale=1.0 / math.sqrt(D))

    def call(single_buffer_invariants):
        can_buffer = single_buffer_invariants and hasattr(pl, "Buffered")

        def spec(shape, idx, invariant=False):
            if invariant and can_buffer:
                # Grid-invariant inputs are DMA'd once: single-buffer them to save VMEM.
                return pl.BlockSpec(shape, idx, pipeline_mode=pl.Buffered(1))
            return pl.BlockSpec(shape, idx)

        in_specs = [
            spec((B, Ns, D), lambda p, k: (0, 0, 0), invariant=True),     # src (resident)
            spec((B, tile, D), lambda p, k: (0, p * KT + k, 0)),          # kv tile
            spec((tile, Ns), lambda p, k: (p * KT + k, 0)),               # w_in rows
            spec((tile, 1), lambda p, k: (p * KT + k, 0)),                # b_in rows
            spec((D, D), lambda p, k: (0, 0), invariant=True),            # Wq^T
            spec((1, D), lambda p, k: (0, 0), invariant=True),            # bq
            spec((D, 2 * D), lambda p, k: (0, 0), invariant=True),        # [Wk|Wv]^T
            spec((1, 2 * D), lambda p, k: (0, 0), invariant=True),        # [bk|bv]
            spec((D, D), lambda p, k: (0, 0), invariant=True),            # Wo^T
            spec((1, D), lambda p, k: (0, 0), invariant=True),            # bo
            spec((tile, Ns), lambda p, k: (p * KT + k, 0)),               # W_out^T rows
        ]
        out_spec = pl.BlockSpec((B, Ns, D), lambda p, k: (p, 0, 0))       # p-th partial

        return pl.pallas_call(
            kernel,
            out_shape=jax.ShapeDtypeStruct((P * B, Ns, D), jnp.float32),
            grid_spec=pltpu.PrefetchScalarGridSpec(
                num_scalar_prefetch=0,
                grid=(P, KT),                     # reduction axis last, per convention
                in_specs=in_specs,
                out_specs=out_spec,
            ),
            compiler_params=pltpu.CompilerParams(
                # p: independent partial sums (shards across v7x's 2 TensorCores);
                # k: carries the output-Linear reduction -> "arbitrary".
                dimension_semantics=("parallel", "arbitrary"),
                vmem_limit_bytes=vmem_limit,
            ),
            cost_estimate=cost,
        )(src_c, kv_c, w_in_c, b_in_c, wq_t, bq, wkv_t, bkv, wo_t, bo, w_out_t)

    try:
        parts = call(True)
    except Exception:
        # pipeline_mode=pl.Buffered(1) unsupported on this backend: default buffering.
        parts = call(False)

    # Sum the P parallel partials, add the output Linear bias, cast back (all in f32).
    out = parts.reshape(P, B, Ns, D).sum(axis=0)
    out = out + b_out.astype(f32)[None, :, None]
    return out.astype(out_dtype)


def traditional_cross_attention(text_feature, image_feature, params, *, block_n=None,
                                parallel_splits=None, compute_dtype=None):
    """Forward of TraditionalCrossAttention. Returns (output_text, output_image)."""
    p = params
    kw = dict(block_n=block_n, parallel_splits=parallel_splits,
              compute_dtype=compute_dtype)
    output_text = _attention_branch(
        text_feature, image_feature,
        p['s2b_w'], p['s2b_b'],
        p['text_in_w'], p['text_in_b'], p['text_out_w'], p['text_out_b'],
        p['sfb_w'], p['sfb_b'], **kw)
    output_image = _attention_branch(
        image_feature, text_feature,
        p['b2s_w'], p['b2s_b'],
        p['image_in_w'], p['image_in_b'], p['image_out_w'], p['image_out_b'],
        p['bfs_w'], p['bfs_b'], **kw)
    return output_text, output_image


# ----------------------------- pure-JAX reference ----------------------------------
def _mha_seq_first_ref(query, key, value, in_w, in_b, out_w, out_b):
    """nn.MultiheadAttention(num_heads=1, batch_first=False) on (L, N, E) inputs."""
    e = query.shape[-1]
    wq, wk, wv = in_w[:e], in_w[e:2 * e], in_w[2 * e:]
    bq, bk, bv = in_b[:e], in_b[e:2 * e], in_b[2 * e:]
    q = query @ wq.T + bq
    k = key @ wk.T + bk
    v = value @ wv.T + bv
    scores = jnp.einsum('lne,sne->nls', q, k) / math.sqrt(e)
    p = jax.nn.softmax(scores, axis=-1)
    out = jnp.einsum('nls,sne->lne', p, v)
    return out @ out_w.T + out_b


def _reference(text_feature, image_feature, params):
    p = params
    q_text = jnp.einsum('btd,it->bid', text_feature, p['s2b_w']) + p['s2b_b'][None, :, None]
    q_image = jnp.einsum('bid,ti->btd', image_feature, p['b2s_w']) + p['b2s_b'][None, :, None]
    attn_text = _mha_seq_first_ref(q_text, image_feature, image_feature,
                                   p['text_in_w'], p['text_in_b'],
                                   p['text_out_w'], p['text_out_b'])
    attn_image = _mha_seq_first_ref(q_image, text_feature, text_feature,
                                    p['image_in_w'], p['image_in_b'],
                                    p['image_out_w'], p['image_out_b'])
    out_text = jnp.einsum('bid,ti->btd', attn_text, p['sfb_w']) + p['sfb_b'][None, :, None]
    out_image = jnp.einsum('btd,it->bid', attn_image, p['bfs_w']) + p['bfs_b'][None, :, None]
    return out_text, out_image


if __name__ == "__main__":
    batch = 2             # PyTorch's seq-first MHA makes this the attention length
    text_seq_len = 16
    image_block_num = 8
    hidden = 128          # text_hidden_dim == image_hidden_dim (module requirement);
                          # 128 keeps the last dim lane-dense on TPU.

    key = jax.random.PRNGKey(0)
    keys = jax.random.split(key, 20)

    text_feature = jax.random.normal(keys[0], (batch, text_seq_len, hidden), jnp.float32)
    image_feature = jax.random.normal(keys[1], (batch, image_block_num, hidden), jnp.float32)

    def linear_init(kw, kb, out_f, in_f):
        bound = 1.0 / math.sqrt(in_f)
        w = jax.random.uniform(kw, (out_f, in_f), jnp.float32, -bound, bound)
        b = jax.random.uniform(kb, (out_f,), jnp.float32, -bound, bound)
        return w, b

    def mha_init(k0, k1, k2, k3, e):
        in_w = jax.random.uniform(k0, (3 * e, e), jnp.float32, -0.1, 0.1)   # in_proj_weight
        in_b = jax.random.uniform(k1, (3 * e,), jnp.float32, -0.1, 0.1)     # in_proj_bias
        out_w, out_b = linear_init(k2, k3, e, e)                            # out_proj
        return in_w, in_b, out_w, out_b

    s2b_w, s2b_b = linear_init(keys[2], keys[3], image_block_num, text_seq_len)
    sfb_w, sfb_b = linear_init(keys[4], keys[5], text_seq_len, image_block_num)
    b2s_w, b2s_b = linear_init(keys[6], keys[7], text_seq_len, image_block_num)
    bfs_w, bfs_b = linear_init(keys[8], keys[9], image_block_num, text_seq_len)
    t_in_w, t_in_b, t_out_w, t_out_b = mha_init(keys[10], keys[11], keys[12], keys[13], hidden)
    i_in_w, i_in_b, i_out_w, i_out_b = mha_init(keys[14], keys[15], keys[16], keys[17], hidden)

    params = dict(
        s2b_w=s2b_w, s2b_b=s2b_b, sfb_w=sfb_w, sfb_b=sfb_b,
        b2s_w=b2s_w, b2s_b=b2s_b, bfs_w=bfs_w, bfs_b=bfs_b,
        text_in_w=t_in_w, text_in_b=t_in_b, text_out_w=t_out_w, text_out_b=t_out_b,
        image_in_w=i_in_w, image_in_b=i_in_b, image_out_w=i_out_w, image_out_b=i_out_b,
    )

    ref_text, ref_image = _reference(text_feature, image_feature, params)

    # --- f32 compute path (matches PyTorch numerics up to the approx EUP reciprocal) ---
    # parallel_splits=2 exercises the dual-TensorCore split on the branch whose Nk has
    # >1 tile (it safely degrades to a sequential loop on single-core chips).
    out_text, out_image = traditional_cross_attention(
        text_feature, image_feature, params, block_n=8, parallel_splits=2)
    out_text, out_image = jax.block_until_ready((out_text, out_image))

    assert out_text.shape == (batch, text_seq_len, hidden)
    assert out_image.shape == (batch, image_block_num, hidden)
    assert jnp.allclose(out_text, ref_text, atol=3e-3, rtol=3e-3), \
        float(jnp.max(jnp.abs(out_text - ref_text)))
    assert jnp.allclose(out_image, ref_image, atol=3e-3, rtol=3e-3), \
        float(jnp.max(jnp.abs(out_image - ref_image)))

    # --- bf16 MXU-operand path (perf feedback): f32 accumulation, f32 softmax/bias ----
    # bf16 rounding through four chained matmuls -> loose sanity tolerance only.
    bt, bi = traditional_cross_attention(
        text_feature, image_feature, params, block_n=8, parallel_splits=2,
        compute_dtype=jnp.bfloat16)
    bt, bi = jax.block_until_ready((bt, bi))
    assert jnp.allclose(bt, ref_text, atol=1e-1, rtol=1e-1), \
        float(jnp.max(jnp.abs(bt - ref_text)))
    assert jnp.allclose(bi, ref_image, atol=1e-1, rtol=1e-1), \
        float(jnp.max(jnp.abs(bi - ref_image)))

    print("KERNEL_OK")
</pallas_src>

<mosaic_0001>
module attributes {stable_mosaic.version = 11 : i64} {
  func.func @_branch_kernel(%arg0: i32, %arg1: i32, %arg2: memref<2x16x128xf32, #tpu.memory_space<vmem>>, %arg3: memref<2x8x128xf32, #tpu.memory_space<vmem>>, %arg4: memref<8x16xf32, #tpu.memory_space<vmem>>, %arg5: memref<8x1xf32, #tpu.memory_space<vmem>>, %arg6: memref<128x128xf32, #tpu.memory_space<vmem>>, %arg7: memref<1x128xf32, #tpu.memory_space<vmem>>, %arg8: memref<128x256xf32, #tpu.memory_space<vmem>>, %arg9: memref<1x256xf32, #tpu.memory_space<vmem>>, %arg10: memref<128x128xf32, #tpu.memory_space<vmem>>, %arg11: memref<1x128xf32, #tpu.memory_space<vmem>>, %arg12: memref<8x16xf32, #tpu.memory_space<vmem>>, %arg13: memref<2x16x128xf32, #tpu.memory_space<vmem>>) attributes {dimension_semantics = [#tpu.dimension_semantics<parallel>, #tpu.dimension_semantics<arbitrary>], iteration_bounds = array<i64: 1, 1>, scalar_prefetch = 0 : i64, scratch_operands = 0 : i64, tpu.core_type = #tpu.core_type<tc>, window_params = [{pipeline_mode = #tpu.pipeline_mode<synchronous>, transform_indices = @transform_0, window_bounds = array<i64: 2, 16, 128>}, {transform_indices = @transform_1, window_bounds = array<i64: 2, 8, 128>}, {transform_indices = @transform_2, window_bounds = array<i64: 8, 16>}, {transform_indices = @transform_3, window_bounds = array<i64: 8, 1>}, {pipeline_mode = #tpu.pipeline_mode<synchronous>, transform_indices = @transform_4, window_bounds = array<i64: 128, 128>}, {pipeline_mode = #tpu.pipeline_mode<synchronous>, transform_indices = @transform_5, window_bounds = array<i64: 1, 128>}, {pipeline_mode = #tpu.pipeline_mode<synchronous>, transform_indices = @transform_6, window_bounds = array<i64: 128, 256>}, {pipeline_mode = #tpu.pipeline_mode<synchronous>, transform_indices = @transform_7, window_bounds = array<i64: 1, 256>}, {pipeline_mode = #tpu.pipeline_mode<synchronous>, transform_indices = @transform_8, window_bounds = array<i64: 128, 128>}, {pipeline_mode = #tpu.pipeline_mode<synchronous>, transform_indices = @transform_9, window_bounds = array<i64: 1, 128>}, {transform_indices = @transform_10, window_bounds = array<i64: 8, 16>}, {transform_indices = @transform_11, window_bounds = array<i64: 2, 16, 128>}]} {
    %c0 = arith.constant 0 : index
    %c0_0 = arith.constant 0 : index
    %0 = vector.load %arg4[%c0, %c0_0] : memref<8x16xf32, #tpu.memory_space<vmem>>, vector<8x16xf32>
    %c0_1 = arith.constant 0 : index
    %c0_2 = arith.constant 0 : index
    %1 = vector.load %arg5[%c0_1, %c0_2] : memref<8x1xf32, #tpu.memory_space<vmem>>, vector<8x1xf32>
    %c0_3 = arith.constant 0 : index
    %c0_4 = arith.constant 0 : index
    %2 = vector.load %arg6[%c0_3, %c0_4] : memref<128x128xf32, #tpu.memory_space<vmem>>, vector<128x128xf32>
    %c0_5 = arith.constant 0 : index
    %c0_6 = arith.constant 0 : index
    %3 = vector.load %arg8[%c0_5, %c0_6] : memref<128x256xf32, #tpu.memory_space<vmem>>, vector<128x256xf32>
    %c0_7 = arith.constant 0 : index
    %c0_8 = arith.constant 0 : index
    %4 = vector.load %arg10[%c0_7, %c0_8] : memref<128x128xf32, #tpu.memory_space<vmem>>, vector<128x128xf32>
    %c0_9 = arith.constant 0 : index
    %c0_10 = arith.constant 0 : index
    %5 = vector.load %arg12[%c0_9, %c0_10] : memref<8x16xf32, #tpu.memory_space<vmem>>, vector<8x16xf32>
    %c0_11 = arith.constant 0 : index
    %c0_12 = arith.constant 0 : index
    %c0_13 = arith.constant 0 : index
    %6 = vector.load %arg3[%c0_11, %c0_12, %c0_13] : memref<2x8x128xf32, #tpu.memory_space<vmem>>, vector<2x8x128xf32>
    %7 = vector.shape_cast %6 : vector<2x8x128xf32> to vector<16x128xf32>
    %cst = arith.constant dense<0.000000e+00> : vector<16x256xf32>
    %8 = tpu.matmul %7, %3, %cst {dimension_numbers = #tpu.dot_dimension_numbers<[1], [0], [0], [1], [0, 0, 1, 1], [], []>} : vector<16x128xf32>, vector<128x256xf32>, vector<16x256xf32> -> vector<16x256xf32>
    %c0_14 = arith.constant 0 : index
    %c0_15 = arith.constant 0 : index
    %9 = vector.load %arg9[%c0_14, %c0_15] : memref<1x256xf32, #tpu.memory_space<vmem>>, vector<1x256xf32>
    %10 = vector.broadcast %9 : vector<1x256xf32> to vector<16x256xf32>
    %11 = arith.addf %8, %10 : vector<16x256xf32>
    %c0_16 = arith.constant 0 : index
    %c0_17 = arith.constant 0 : index
    %c0_18 = arith.constant 0 : index
    %12 = vector.load %arg2[%c0_16, %c0_17, %c0_18] : memref<2x16x128xf32, #tpu.memory_space<vmem>>, vector<1x16x128xf32>
    %13 = vector.shape_cast %12 : vector<1x16x128xf32> to vector<16x128xf32>
    %cst_19 = arith.constant dense<0.000000e+00> : vector<8x128xf32>
    %14 = tpu.matmul %0, %13, %cst_19 {dimension_numbers = #tpu.dot_dimension_numbers<[1], [0], [0], [1], [0, 0, 1, 1], [], []>} : vector<8x16xf32>, vector<16x128xf32>, vector<8x128xf32> -> vector<8x128xf32>
    %15 = vector.broadcast %1 : vector<8x1xf32> to vector<8x128xf32>
    %16 = arith.addf %14, %15 : vector<8x128xf32>
    %c1 = arith.constant 1 : index
    %c0_20 = arith.constant 0 : index
    %c0_21 = arith.constant 0 : index
    %17 = vector.load %arg2[%c1, %c0_20, %c0_21] : memref<2x16x128xf32, #tpu.memory_space<vmem>>, vector<1x16x128xf32>
    %18 = vector.shape_cast %17 : vector<1x16x128xf32> to vector<16x128xf32>
    %cst_22 = arith.constant dense<0.000000e+00> : vector<8x128xf32>
    %19 = tpu.matmul %0, %18, %cst_22 {dimension_numbers = #tpu.dot_dimension_numbers<[1], [0], [0], [1], [0, 0, 1, 1], [], []>} : vector<8x16xf32>, vector<16x128xf32>, vector<8x128xf32> -> vector<8x128xf32>
    %20 = vector.broadcast %1 : vector<8x1xf32> to vector<8x128xf32>
    %21 = arith.addf %19, %20 : vector<8x128xf32>
    %22 = tpu.concatenate %16, %21 in 0 : vector<8x128xf32>, vector<8x128xf32> -> vector<16x128xf32>
    %cst_23 = arith.constant dense<0.000000e+00> : vector<16x128xf32>
    %23 = tpu.matmul %22, %2, %cst_23 {dimension_numbers = #tpu.dot_dimension_numbers<[1], [0], [0], [1], [0, 0, 1, 1], [], []>} : vector<16x128xf32>, vector<128x128xf32>, vector<16x128xf32> -> vector<16x128xf32>
    %c0_24 = arith.constant 0 : index
    %c0_25 = arith.constant 0 : index
    %24 = vector.load %arg7[%c0_24, %c0_25] : memref<1x128xf32, #tpu.memory_space<vmem>>, vector<1x128xf32>
    %25 = vector.broadcast %24 : vector<1x128xf32> to vector<16x128xf32>
    %26 = arith.addf %23, %25 : vector<16x128xf32>
    %cst_26 = arith.constant 0.0883883461 : f32
    %27 = vector.broadcast %cst_26 : f32 to vector<16x128xf32>
    %28 = arith.mulf %26, %27 : vector<16x128xf32>
    %29 = vector.extract_strided_slice %28 {offsets = [0, 0], sizes = [8, 128], strides = [1, 1]} : vector<16x128xf32> to vector<8x128xf32>
    %30 = vector.extract_strided_slice %11 {offsets = [0, 0], sizes = [8, 128], strides = [1, 1]} : vector<16x256xf32> to vector<8x128xf32>
    %31 = arith.mulf %29, %30 : vector<8x128xf32>
    %cst_27 = arith.constant dense<0.000000e+00> : vector<8xf32>
    %32 = vector.multi_reduction <add>, %31, %cst_27 [1] : vector<8x128xf32> to vector<8xf32>
    %33 = vector.shape_cast %32 : vector<8xf32> to vector<8x1xf32>
    %34 = vector.extract_strided_slice %11 {offsets = [8, 0], sizes = [8, 128], strides = [1, 1]} : vector<16x256xf32> to vector<8x128xf32>
    %35 = arith.mulf %29, %34 : vector<8x128xf32>
    %cst_28 = arith.constant dense<0.000000e+00> : vector<8xf32>
    %36 = vector.multi_reduction <add>, %35, %cst_28 [1] : vector<8x128xf32> to vector<8xf32>
    %37 = vector.shape_cast %36 : vector<8xf32> to vector<8x1xf32>
    %38 = arith.maximumf %33, %37 : vector<8x1xf32>
    %39 = arith.subf %33, %38 : vector<8x1xf32>
    %40 = math.exp %39 : vector<8x1xf32>
    %41 = arith.subf %37, %38 : vector<8x1xf32>
    %42 = math.exp %41 : vector<8x1xf32>
    %43 = arith.addf %40, %42 : vector<8x1xf32>
    %44 = tpu.reciprocal %43 {approx = true} : vector<8x1xf32> -> vector<8x1xf32>
    %45 = arith.mulf %40, %44 : vector<8x1xf32>
    %46 = vector.extract_strided_slice %11 {offsets = [0, 128], sizes = [8, 128], strides = [1, 1]} : vector<16x256xf32> to vector<8x128xf32>
    %47 = vector.broadcast %45 : vector<8x1xf32> to vector<8x128xf32>
    %48 = arith.mulf %47, %46 : vector<8x128xf32>
    %49 = arith.mulf %42, %44 : vector<8x1xf32>
    %50 = vector.extract_strided_slice %11 {offsets = [8, 128], sizes = [8, 128], strides = [1, 1]} : vector<16x256xf32> to vector<8x128xf32>
    %51 = vector.broadcast %49 : vector<8x1xf32> to vector<8x128xf32>
    %52 = arith.mulf %51, %50 : vector<8x128xf32>
    %53 = arith.addf %48, %52 : vector<8x128xf32>
    %54 = vector.extract_strided_slice %28 {offsets = [8, 0], sizes = [8, 128], strides = [1, 1]} : vector<16x128xf32> to vector<8x128xf32>
    %55 = vector.extract_strided_slice %11 {offsets = [0, 0], sizes = [8, 128], strides = [1, 1]} : vector<16x256xf32> to vector<8x128xf32>
    %56 = arith.mulf %54, %55 : vector<8x128xf32>
    %cst_29 = arith.constant dense<0.000000e+00> : vector<8xf32>
    %57 = vector.multi_reduction <add>, %56, %cst_29 [1] : vector<8x128xf32> to vector<8xf32>
    %58 = vector.shape_cast %57 : vector<8xf32> to vector<8x1xf32>
    %59 = vector.extract_strided_slice %11 {offsets = [8, 0], sizes = [8, 128], strides = [1, 1]} : vector<16x256xf32> to vector<8x128xf32>
    %60 = arith.mulf %54, %59 : vector<8x128xf32>
    %cst_30 = arith.constant dense<0.000000e+00> : vector<8xf32>
    %61 = vector.multi_reduction <add>, %60, %cst_30 [1] : vector<8x128xf32> to vector<8xf32>
    %62 = vector.shape_cast %61 : vector<8xf32> to vector<8x1xf32>
    %63 = arith.maximumf %58, %62 : vector<8x1xf32>
    %64 = arith.subf %58, %63 : vector<8x1xf32>
    %65 = math.exp %64 : vector<8x1xf32>
    %66 = arith.subf %62, %63 : vector<8x1xf32>
    %67 = math.exp %66 : vector<8x1xf32>
    %68 = arith.addf %65, %67 : vector<8x1xf32>
    %69 = tpu.reciprocal %68 {approx = true} : vector<8x1xf32> -> vector<8x1xf32>
    %70 = arith.mulf %65, %69 : vector<8x1xf32>
    %71 = vector.extract_strided_slice %11 {offsets = [0, 128], sizes = [8, 128], strides = [1, 1]} : vector<16x256xf32> to vector<8x128xf32>
    %72 = vector.broadcast %70 : vector<8x1xf32> to vector<8x128xf32>
    %73 = arith.mulf %72, %71 : vector<8x128xf32>
    %74 = arith.mulf %67, %69 : vector<8x1xf32>
    %75 = vector.extract_strided_slice %11 {offsets = [8, 128], sizes = [8, 128], strides = [1, 1]} : vector<16x256xf32> to vector<8x128xf32>
    %76 = vector.broadcast %74 : vector<8x1xf32> to vector<8x128xf32>
    %77 = arith.mulf %76, %75 : vector<8x128xf32>
    %78 = arith.addf %73, %77 : vector<8x128xf32>
    %79 = tpu.concatenate %53, %78 in 0 : vector<8x128xf32>, vector<8x128xf32> -> vector<16x128xf32>
    %cst_31 = arith.constant dense<0.000000e+00> : vector<16x128xf32>
    %80 = tpu.matmul %79, %4, %cst_31 {dimension_numbers = #tpu.dot_dimension_numbers<[1], [0], [0], [1], [0, 0, 1, 1], [], []>} : vector<16x128xf32>, vector<128x128xf32>, vector<16x128xf32> -> vector<16x128xf32>
    %c0_32 = arith.constant 0 : index
    %c0_33 = arith.constant 0 : index
    %81 = vector.load %arg11[%c0_32, %c0_33] : memref<1x128xf32, #tpu.memory_space<vmem>>, vector<1x128xf32>
    %82 = vector.broadcast %81 : vector<1x128xf32> to vector<16x128xf32>
    %83 = arith.addf %80, %82 : vector<16x128xf32>
    %84 = vector.extract_strided_slice %83 {offsets = [0, 0], sizes = [8, 128], strides = [1, 1]} : vector<16x128xf32> to vector<8x128xf32>
    %cst_34 = arith.constant dense<0.000000e+00> : vector<16x128xf32>
    %85 = tpu.matmul %5, %84, %cst_34 {dimension_numbers = #tpu.dot_dimension_numbers<[0], [0], [1], [1], [0, 1, 1, 1], [], []>} : vector<8x16xf32>, vector<8x128xf32>, vector<16x128xf32> -> vector<16x128xf32>
    %86 = vector.extract_strided_slice %83 {offsets = [8, 0], sizes = [8, 128], strides = [1, 1]} : vector<16x128xf32> to vector<8x128xf32>
    %cst_35 = arith.constant dense<0.000000e+00> : vector<16x128xf32>
    %87 = tpu.matmul %5, %86, %cst_35 {dimension_numbers = #tpu.dot_dimension_numbers<[0], [0], [1], [1], [0, 1, 1, 1], [], []>} : vector<8x16xf32>, vector<8x128xf32>, vector<16x128xf32> -> vector<16x128xf32>
    %88 = vector.shape_cast %85 : vector<16x128xf32> to vector<1x16x128xf32>
    %89 = vector.shape_cast %87 : vector<16x128xf32> to vector<1x16x128xf32>
    %90 = tpu.concatenate %88, %89 in 0 : vector<1x16x128xf32>, vector<1x16x128xf32> -> vector<2x16x128xf32>
    %c0_i32 = arith.constant 0 : i32
    %91 = arith.cmpi eq, %arg1, %c0_i32 : i32
    %92 = arith.extui %91 : i1 to i32
    %c0_i32_36 = arith.constant 0 : i32
    %93 = arith.cmpi ne, %92, %c0_i32_36 : i32
    scf.if %93 {
      %c0_39 = arith.constant 0 : index
      %c0_40 = arith.constant 0 : index
      %c0_41 = arith.constant 0 : index
      %97 = vector.load %arg13[%c0_39, %c0_40, %c0_41] : memref<2x16x128xf32, #tpu.memory_space<vmem>>, vector<2x16x128xf32>
      tpu.vector_store %arg13[%c0_39, %c0_40, %c0_41], %90 {strides = array<i32>} : memref<2x16x128xf32, #tpu.memory_space<vmem>>, vector<2x16x128xf32>,
    } else {
    }
    %c0_i32_37 = arith.constant 0 : i32
    %94 = arith.cmpi ne, %arg1, %c0_i32_37 : i32
    %95 = arith.extui %94 : i1 to i32
    %c0_i32_38 = arith.constant 0 : i32
    %96 = arith.cmpi ne, %95, %c0_i32_38 : i32
    scf.if %96 {
      %c0_39 = arith.constant 0 : index
      %c0_40 = arith.constant 0 : index
      %c0_41 = arith.constant 0 : index
      %97 = vector.load %arg13[%c0_39, %c0_40, %c0_41] : memref<2x16x128xf32, #tpu.memory_space<vmem>>, vector<2x16x128xf32>
      %98 = arith.addf %97, %90 : vector<2x16x128xf32>
      %c0_42 = arith.constant 0 : index
      %c0_43 = arith.constant 0 : index
      %c0_44 = arith.constant 0 : index
      %99 = vector.load %arg13[%c0_42, %c0_43, %c0_44] : memref<2x16x128xf32, #tpu.memory_space<vmem>>, vector<2x16x128xf32>
      tpu.vector_store %arg13[%c0_42, %c0_43, %c0_44], %98 {strides = array<i32>} : memref<2x16x128xf32, #tpu.memory_space<vmem>>, vector<2x16x128xf32>,
    } else {
    }
    return
  }
  func.func @transform_0(%arg0: i32, %arg1: i32) -> (i32, i32, i32) {
    %c0_i32 = arith.constant 0 : i32
    %c0_i32_0 = arith.constant 0 : i32
    %c0_i32_1 = arith.constant 0 : i32
    %c0_i32_2 = arith.constant 0 : i32
    return %c0_i32, %c0_i32_0, %c0_i32_1 : i32, i32, i32
  }
  func.func @transform_1(%arg0: i32, %arg1: i32) -> (i32, i32, i32) {
    %c1_i32 = arith.constant 1 : i32
    %0 = arith.muli %arg0, %c1_i32 : i32
    %1 = arith.addi %0, %arg1 : i32
    %c0_i32 = arith.constant 0 : i32
    %c0_i32_0 = arith.constant 0 : i32
    %c0_i32_1 = arith.constant 0 : i32
    return %c0_i32, %1, %c0_i32_0 : i32, i32, i32
  }
  func.func @transform_2(%arg0: i32, %arg1: i32) -> (i32, i32) {
    %c1_i32 = arith.constant 1 : i32
    %0 = arith.muli %arg0, %c1_i32 : i32
    %1 = arith.addi %0, %arg1 : i32
    %c0_i32 = arith.constant 0 : i32
    %c0_i32_0 = arith.constant 0 : i32
    return %1, %c0_i32 : i32, i32
  }
  func.func @transform_3(%arg0: i32, %arg1: i32) -> (i32, i32) {
    %c1_i32 = arith.constant 1 : i32
    %0 = arith.muli %arg0, %c1_i32 : i32
    %1 = arith.addi %0, %arg1 : i32
    %c0_i32 = arith.constant 0 : i32
    %c0_i32_0 = arith.constant 0 : i32
    return %1, %c0_i32 : i32, i32
  }
  func.func @transform_4(%arg0: i32, %arg1: i32) -> (i32, i32) {
    %c0_i32 = arith.constant 0 : i32
    %c0_i32_0 = arith.constant 0 : i32
    %c0_i32_1 = arith.constant 0 : i32
    return %c0_i32, %c0_i32_0 : i32, i32
  }
  func.func @transform_5(%arg0: i32, %arg1: i32) -> (i32, i32) {
    %c0_i32 = arith.constant 0 : i32
    %c0_i32_0 = arith.constant 0 : i32
    %c0_i32_1 = arith.constant 0 : i32
    return %c0_i32, %c0_i32_0 : i32, i32
  }
  func.func @transform_6(%arg0: i32, %arg1: i32) -> (i32, i32) {
    %c0_i32 = arith.constant 0 : i32
    %c0_i32_0 = arith.constant 0 : i32
    %c0_i32_1 = arith.constant 0 : i32
    return %c0_i32, %c0_i32_0 : i32, i32
  }
  func.func @transform_7(%arg0: i32, %arg1: i32) -> (i32, i32) {
    %c0_i32 = arith.constant 0 : i32
    %c0_i32_0 = arith.constant 0 : i32
    %c0_i32_1 = arith.constant 0 : i32
    return %c0_i32, %c0_i32_0 : i32, i32
  }
  func.func @transform_8(%arg0: i32, %arg1: i32) -> (i32, i32) {
    %c0_i32 = arith.constant 0 : i32
    %c0_i32_0 = arith.constant 0 : i32
    %c0_i32_1 = arith.constant 0 : i32
    return %c0_i32, %c0_i32_0 : i32, i32
  }
  func.func @transform_9(%arg0: i32, %arg1: i32) -> (i32, i32) {
    %c0_i32 = arith.constant 0 : i32
    %c0_i32_0 = arith.constant 0 : i32
    %c0_i32_1 = arith.constant 0 : i32
    return %c0_i32, %c0_i32_0 : i32, i32
  }
  func.func @transform_10(%arg0: i32, %arg1: i32) -> (i32, i32) {
    %c1_i32 = arith.constant 1 : i32
    %0 = arith.muli %arg0, %c1_i32 : i32
    %1 = arith.addi %0, %arg1 : i32
    %c0_i32 = arith.constant 0 : i32
    %c0_i32_0 = arith.constant 0 : i32
    return %1, %c0_i32 : i32, i32
  }
  func.func @transform_11(%arg0: i32, %arg1: i32) -> (i32, i32, i32) {
    %c0_i32 = arith.constant 0 : i32
    %c0_i32_0 = arith.constant 0 : i32
    %c0_i32_1 = arith.constant 0 : i32
    return %arg0, %c0_i32, %c0_i32_0 : i32, i32, i32
  }
}

module attributes {stable_mosaic.version = 11 : i64} {
  func.func @_branch_kernel(%arg0: i32, %arg1: i32, %arg2: memref<2x16x128xf32, #tpu.memory_space<vmem>>, %arg3: memref<2x8x128xf32, #tpu.memory_space<vmem>>, %arg4: memref<8x16xf32, #tpu.memory_space<vmem>>, %arg5: memref<8x1xf32, #tpu.memory_space<vmem>>, %arg6: memref<128x128xf32, #tpu.memory_space<vmem>>, %arg7: memref<1x128xf32, #tpu.memory_space<vmem>>, %arg8: memref<128x256xf32, #tpu.memory_space<vmem>>, %arg9: memref<1x256xf32, #tpu.memory_space<vmem>>, %arg10: memref<128x128xf32, #tpu.memory_space<vmem>>, %arg11: memref<1x128xf32, #tpu.memory_space<vmem>>, %arg12: memref<8x16xf32, #tpu.memory_space<vmem>>, %arg13: memref<2x16x128xf32, #tpu.memory_space<vmem>>) attributes {dimension_semantics = [#tpu.dimension_semantics<parallel>, #tpu.dimension_semantics<arbitrary>], iteration_bounds = array<i64: 1, 1>, scalar_prefetch = 0 : i64, scratch_operands = 0 : i64, tpu.core_type = #tpu.core_type<tc>, window_params = [{pipeline_mode = #tpu.pipeline_mode<synchronous>, transform_indices = @transform_0, window_bounds = array<i64: 2, 16, 128>}, {transform_indices = @transform_1, window_bounds = array<i64: 2, 8, 128>}, {transform_indices = @transform_2, window_bounds = array<i64: 8, 16>}, {transform_indices = @transform_3, window_bounds = array<i64: 8, 1>}, {pipeline_mode = #tpu.pipeline_mode<synchronous>, transform_indices = @transform_4, window_bounds = array<i64: 128, 128>}, {pipeline_mode = #tpu.pipeline_mode<synchronous>, transform_indices = @transform_5, window_bounds = array<i64: 1, 128>}, {pipeline_mode = #tpu.pipeline_mode<synchronous>, transform_indices = @transform_6, window_bounds = array<i64: 128, 256>}, {pipeline_mode = #tpu.pipeline_mode<synchronous>, transform_indices = @transform_7, window_bounds = array<i64: 1, 256>}, {pipeline_mode = #tpu.pipeline_mode<synchronous>, transform_indices = @transform_8, window_bounds = array<i64: 128, 128>}, {pipeline_mode = #tpu.pipeline_mode<synchronous>, transform_indices = @transform_9, window_bounds = array<i64: 1, 128>}, {transform_indices = @transform_10, window_bounds = array<i64: 8, 16>}, {transform_indices = @transform_11, window_bounds = array<i64: 2, 16, 128>}]} {
    %c0 = arith.constant 0 : index
    %c0_0 = arith.constant 0 : index
    %0 = vector.load %arg4[%c0, %c0_0] : memref<8x16xf32, #tpu.memory_space<vmem>>, vector<8x16xf32>
    %c0_1 = arith.constant 0 : index
    %c0_2 = arith.constant 0 : index
    %1 = vector.load %arg5[%c0_1, %c0_2] : memref<8x1xf32, #tpu.memory_space<vmem>>, vector<8x1xf32>
    %c0_3 = arith.constant 0 : index
    %c0_4 = arith.constant 0 : index
    %2 = vector.load %arg6[%c0_3, %c0_4] : memref<128x128xf32, #tpu.memory_space<vmem>>, vector<128x128xf32>
    %c0_5 = arith.constant 0 : index
    %c0_6 = arith.constant 0 : index
    %3 = vector.load %arg8[%c0_5, %c0_6] : memref<128x256xf32, #tpu.memory_space<vmem>>, vector<128x256xf32>
    %c0_7 = arith.constant 0 : index
    %c0_8 = arith.constant 0 : index
    %4 = vector.load %arg10[%c0_7, %c0_8] : memref<128x128xf32, #tpu.memory_space<vmem>>, vector<128x128xf32>
    %c0_9 = arith.constant 0 : index
    %c0_10 = arith.constant 0 : index
    %5 = vector.load %arg12[%c0_9, %c0_10] : memref<8x16xf32, #tpu.memory_space<vmem>>, vector<8x16xf32>
    %c0_11 = arith.constant 0 : index
    %c0_12 = arith.constant 0 : index
    %c0_13 = arith.constant 0 : index
    %6 = vector.load %arg3[%c0_11, %c0_12, %c0_13] : memref<2x8x128xf32, #tpu.memory_space<vmem>>, vector<2x8x128xf32>
    %7 = vector.shape_cast %6 : vector<2x8x128xf32> to vector<16x128xf32>
    %cst = arith.constant dense<0.000000e+00> : vector<16x256xf32>
    %8 = tpu.matmul %7, %3, %cst {dimension_numbers = #tpu.dot_dimension_numbers<[1], [0], [0], [1], [0, 0, 1, 1], [], []>} : vector<16x128xf32>, vector<128x256xf32>, vector<16x256xf32> -> vector<16x256xf32>
    %c0_14 = arith.constant 0 : index
    %c0_15 = arith.constant 0 : index
    %9 = vector.load %arg9[%c0_14, %c0_15] : memref<1x256xf32, #tpu.memory_space<vmem>>, vector<1x256xf32>
    %10 = vector.broadcast %9 : vector<1x256xf32> to vector<16x256xf32>
    %11 = arith.addf %8, %10 : vector<16x256xf32>
    %c0_16 = arith.constant 0 : index
    %c0_17 = arith.constant 0 : index
    %c0_18 = arith.constant 0 : index
    %12 = vector.load %arg2[%c0_16, %c0_17, %c0_18] : memref<2x16x128xf32, #tpu.memory_space<vmem>>, vector<1x16x128xf32>
    %13 = vector.shape_cast %12 : vector<1x16x128xf32> to vector<16x128xf32>
    %cst_19 = arith.constant dense<0.000000e+00> : vector<8x128xf32>
    %14 = tpu.matmul %0, %13, %cst_19 {dimension_numbers = #tpu.dot_dimension_numbers<[1], [0], [0], [1], [0, 0, 1, 1], [], []>} : vector<8x16xf32>, vector<16x128xf32>, vector<8x128xf32> -> vector<8x128xf32>
    %15 = vector.broadcast %1 : vector<8x1xf32> to vector<8x128xf32>
    %16 = arith.addf %14, %15 : vector<8x128xf32>
    %c1 = arith.constant 1 : index
    %c0_20 = arith.constant 0 : index
    %c0_21 = arith.constant 0 : index
    %17 = vector.load %arg2[%c1, %c0_20, %c0_21] : memref<2x16x128xf32, #tpu.memory_space<vmem>>, vector<1x16x128xf32>
    %18 = vector.shape_cast %17 : vector<1x16x128xf32> to vector<16x128xf32>
    %cst_22 = arith.constant dense<0.000000e+00> : vector<8x128xf32>
    %19 = tpu.matmul %0, %18, %cst_22 {dimension_numbers = #tpu.dot_dimension_numbers<[1], [0], [0], [1], [0, 0, 1, 1], [], []>} : vector<8x16xf32>, vector<16x128xf32>, vector<8x128xf32> -> vector<8x128xf32>
    %20 = vector.broadcast %1 : vector<8x1xf32> to vector<8x128xf32>
    %21 = arith.addf %19, %20 : vector<8x128xf32>
    %22 = tpu.concatenate %16, %21 in 0 : vector<8x128xf32>, vector<8x128xf32> -> vector<16x128xf32>
    %cst_23 = arith.constant dense<0.000000e+00> : vector<16x128xf32>
    %23 = tpu.matmul %22, %2, %cst_23 {dimension_numbers = #tpu.dot_dimension_numbers<[1], [0], [0], [1], [0, 0, 1, 1], [], []>} : vector<16x128xf32>, vector<128x128xf32>, vector<16x128xf32> -> vector<16x128xf32>
    %c0_24 = arith.constant 0 : index
    %c0_25 = arith.constant 0 : index
    %24 = vector.load %arg7[%c0_24, %c0_25] : memref<1x128xf32, #tpu.memory_space<vmem>>, vector<1x128xf32>
    %25 = vector.broadcast %24 : vector<1x128xf32> to vector<16x128xf32>
    %26 = arith.addf %23, %25 : vector<16x128xf32>
    %cst_26 = arith.constant 0.0883883461 : f32
    %27 = vector.broadcast %cst_26 : f32 to vector<16x128xf32>
    %28 = arith.mulf %26, %27 : vector<16x128xf32>
    %29 = vector.extract_strided_slice %28 {offsets = [0, 0], sizes = [8, 128], strides = [1, 1]} : vector<16x128xf32> to vector<8x128xf32>
    %30 = vector.extract_strided_slice %11 {offsets = [0, 0], sizes = [8, 128], strides = [1, 1]} : vector<16x256xf32> to vector<8x128xf32>
    %31 = arith.mulf %29, %30 : vector<8x128xf32>
    %cst_27 = arith.constant dense<0.000000e+00> : vector<8xf32>
    %32 = vector.multi_reduction <add>, %31, %cst_27 [1] : vector<8x128xf32> to vector<8xf32>
    %33 = vector.shape_cast %32 : vector<8xf32> to vector<8x1xf32>
    %34 = vector.extract_strided_slice %11 {offsets = [8, 0], sizes = [8, 128], strides = [1, 1]} : vector<16x256xf32> to vector<8x128xf32>
    %35 = arith.mulf %29, %34 : vector<8x128xf32>
    %cst_28 = arith.constant dense<0.000000e+00> : vector<8xf32>
    %36 = vector.multi_reduction <add>, %35, %cst_28 [1] : vector<8x128xf32> to vector<8xf32>
    %37 = vector.shape_cast %36 : vector<8xf32> to vector<8x1xf32>
    %38 = arith.maximumf %33, %37 : vector<8x1xf32>
    %39 = arith.subf %33, %38 : vector<8x1xf32>
    %40 = math.exp %39 : vector<8x1xf32>
    %41 = arith.subf %37, %38 : vector<8x1xf32>
    %42 = math.exp %41 : vector<8x1xf32>
    %43 = arith.addf %40, %42 : vector<8x1xf32>
    %44 = tpu.reciprocal %43 {approx = true} : vector<8x1xf32> -> vector<8x1xf32>
    %45 = arith.mulf %40, %44 : vector<8x1xf32>
    %46 = vector.extract_strided_slice %11 {offsets = [0, 128], sizes = [8, 128], strides = [1, 1]} : vector<16x256xf32> to vector<8x128xf32>
    %47 = vector.broadcast %45 : vector<8x1xf32> to vector<8x128xf32>
    %48 = arith.mulf %47, %46 : vector<8x128xf32>
    %49 = arith.mulf %42, %44 : vector<8x1xf32>
    %50 = vector.extract_strided_slice %11 {offsets = [8, 128], sizes = [8, 128], strides = [1, 1]} : vector<16x256xf32> to vector<8x128xf32>
    %51 = vector.broadcast %49 : vector<8x1xf32> to vector<8x128xf32>
    %52 = arith.mulf %51, %50 : vector<8x128xf32>
    %53 = arith.addf %48, %52 : vector<8x128xf32>
    %54 = vector.extract_strided_slice %28 {offsets = [8, 0], sizes = [8, 128], strides = [1, 1]} : vector<16x128xf32> to vector<8x128xf32>
    %55 = vector.extract_strided_slice %11 {offsets = [0, 0], sizes = [8, 128], strides = [1, 1]} : vector<16x256xf32> to vector<8x128xf32>
    %56 = arith.mulf %54, %55 : vector<8x128xf32>
    %cst_29 = arith.constant dense<0.000000e+00> : vector<8xf32>
    %57 = vector.multi_reduction <add>, %56, %cst_29 [1] : vector<8x128xf32> to vector<8xf32>
    %58 = vector.shape_cast %57 : vector<8xf32> to vector<8x1xf32>
    %59 = vector.extract_strided_slice %11 {offsets = [8, 0], sizes = [8, 128], strides = [1, 1]} : vector<16x256xf32> to vector<8x128xf32>
    %60 = arith.mulf %54, %59 : vector<8x128xf32>
    %cst_30 = arith.constant dense<0.000000e+00> : vector<8xf32>
    %61 = vector.multi_reduction <add>, %60, %cst_30 [1] : vector<8x128xf32> to vector<8xf32>
    %62 = vector.shape_cast %61 : vector<8xf32> to vector<8x1xf32>
    %63 = arith.maximumf %58, %62 : vector<8x1xf32>
    %64 = arith.subf %58, %63 : vector<8x1xf32>
    %65 = math.exp %64 : vector<8x1xf32>
    %66 = arith.subf %62, %63 : vector<8x1xf32>
    %67 = math.exp %66 : vector<8x1xf32>
    %68 = arith.addf %65, %67 : vector<8x1xf32>
    %69 = tpu.reciprocal %68 {approx = true} : vector<8x1xf32> -> vector<8x1xf32>
    %70 = arith.mulf %65, %69 : vector<8x1xf32>
    %71 = vector.extract_strided_slice %11 {offsets = [0, 128], sizes = [8, 128], strides = [1, 1]} : vector<16x256xf32> to vector<8x128xf32>
    %72 = vector.broadcast %70 : vector<8x1xf32> to vector<8x128xf32>
    %73 = arith.mulf %72, %71 : vector<8x128xf32>
    %74 = arith.mulf %67, %69 : vector<8x1xf32>
    %75 = vector.extract_strided_slice %11 {offsets = [8, 128], sizes = [8, 128], strides = [1, 1]} : vector<16x256xf32> to vector<8x128xf32>
    %76 = vector.broadcast %74 : vector<8x1xf32> to vector<8x128xf32>
    %77 = arith.mulf %76, %75 : vector<8x128xf32>
    %78 = arith.addf %73, %77 : vector<8x128xf32>
    %79 = tpu.concatenate %53, %78 in 0 : vector<8x128xf32>, vector<8x128xf32> -> vector<16x128xf32>
    %cst_31 = arith.constant dense<0.000000e+00> : vector<16x128xf32>
    %80 = tpu.matmul %79, %4, %cst_31 {dimension_numbers = #tpu.dot_dimension_numbers<[1], [0], [0], [1], [0, 0, 1, 1], [], []>} : vector<16x128xf32>, vector<128x128xf32>, vector<16x128xf32> -> vector<16x128xf32>
    %c0_32 = arith.constant 0 : index
    %c0_33 = arith.constant 0 : index
    %81 = vector.load %arg11[%c0_32, %c0_33] : memref<1x128xf32, #tpu.memory_space<vmem>>, vector<1x128xf32>
    %82 = vector.broadcast %81 : vector<1x128xf32> to vector<16x128xf32>
    %83 = arith.addf %80, %82 : vector<16x128xf32>
    %84 = vector.extract_strided_slice %83 {offsets = [0, 0], sizes = [8, 128], strides = [1, 1]} : vector<16x128xf32> to vector<8x128xf32>
    %cst_34 = arith.constant dense<0.000000e+00> : vector<16x128xf32>
    %85 = tpu.matmul %5, %84, %cst_34 {dimension_numbers = #tpu.dot_dimension_numbers<[0], [0], [1], [1], [0, 1, 1, 1], [], []>} : vector<8x16xf32>, vector<8x128xf32>, vector<16x128xf32> -> vector<16x128xf32>
    %86 = vector.extract_strided_slice %83 {offsets = [8, 0], sizes = [8, 128], strides = [1, 1]} : vector<16x128xf32> to vector<8x128xf32>
    %cst_35 = arith.constant dense<0.000000e+00> : vector<16x128xf32>
    %87 = tpu.matmul %5, %86, %cst_35 {dimension_numbers = #tpu.dot_dimension_numbers<[0], [0], [1], [1], [0, 1, 1, 1], [], []>} : vector<8x16xf32>, vector<8x128xf32>, vector<16x128xf32> -> vector<16x128xf32>
    %88 = vector.shape_cast %85 : vector<16x128xf32> to vector<1x16x128xf32>
    %89 = vector.shape_cast %87 : vector<16x128xf32> to vector<1x16x128xf32>
    %90 = tpu.concatenate %88, %89 in 0 : vector<1x16x128xf32>, vector<1x16x128xf32> -> vector<2x16x128xf32>
    %c0_i32 = arith.constant 0 : i32
    %91 = arith.cmpi eq, %arg1, %c0_i32 : i32
    %92 = arith.extui %91 : i1 to i32
    %c0_i32_36 = arith.constant 0 : i32
    %93 = arith.cmpi ne, %92, %c0_i32_36 : i32
    scf.if %93 {
      %c0_39 = arith.constant 0 : index
      %c0_40 = arith.constant 0 : index
      %c0_41 = arith.constant 0 : index
      %97 = vector.load %arg13[%c0_39, %c0_40, %c0_41] : memref<2x16x128xf32, #tpu.memory_space<vmem>>, vector<2x16x128xf32>
      tpu.vector_store %arg13[%c0_39, %c0_40, %c0_41], %90 {strides = array<i32>} : memref<2x16x128xf32, #tpu.memory_space<vmem>>, vector<2x16x128xf32>,
    } else {
    }
    %c0_i32_37 = arith.constant 0 : i32
    %94 = arith.cmpi ne, %arg1, %c0_i32_37 : i32
    %95 = arith.extui %94 : i1 to i32
    %c0_i32_38 = arith.constant 0 : i32
    %96 = arith.cmpi ne, %95, %c0_i32_38 : i32
    scf.if %96 {
      %c0_39 = arith.constant 0 : index
      %c0_40 = arith.constant 0 : index
      %c0_41 = arith.constant 0 : index
      %97 = vector.load %arg13[%c0_39, %c0_40, %c0_41] : memref<2x16x128xf32, #tpu.memory_space<vmem>>, vector<2x16x128xf32>
      %98 = arith.addf %97, %90 : vector<2x16x128xf32>
      %c0_42 = arith.constant 0 : index
      %c0_43 = arith.constant 0 : index
      %c0_44 = arith.constant 0 : index
      %99 = vector.load %arg13[%c0_42, %c0_43, %c0_44] : memref<2x16x128xf32, #tpu.memory_space<vmem>>, vector<2x16x128xf32>
      tpu.vector_store %arg13[%c0_42, %c0_43, %c0_44], %98 {strides = array<i32>} : memref<2x16x128xf32, #tpu.memory_space<vmem>>, vector<2x16x128xf32>,
    } else {
    }
    return
  }
  func.func @transform_0(%arg0: i32, %arg1: i32) -> (i32, i32, i32) {
    %c0_i32 = arith.constant 0 : i32
    %c0_i32_0 = arith.constant 0 : i32
    %c0_i32_1 = arith.constant 0 : i32
    %c0_i32_2 = arith.constant 0 : i32
    return %c0_i32, %c0_i32_0, %c0_i32_1 : i32, i32, i32
  }
  func.func @transform_1(%arg0: i32, %arg1: i32) -> (i32, i32, i32) {
    %c1_i32 = arith.constant 1 : i32
    %0 = arith.muli %arg0, %c1_i32 : i32
    %1 = arith.addi %0, %arg1 : i32
    %c0_i32 = arith.constant 0 : i32
    %c0_i32_0 = arith.constant 0 : i32
    %c0_i32_1 = arith.constant 0 : i32
    return %c0_i32, %1, %c0_i32_0 : i32, i32, i32
  }
  func.func @transform_2(%arg0: i32, %arg1: i32) -> (i32, i32) {
    %c1_i32 = arith.constant 1 : i32
    %0 = arith.muli %arg0, %c1_i32 : i32
    %1 = arith.addi %0, %arg1 : i32
    %c0_i32 = arith.constant 0 : i32
    %c0_i32_0 = arith.constant 0 : i32
    return %1, %c0_i32 : i32, i32
  }
  func.func @transform_3(%arg0: i32, %arg1: i32) -> (i32, i32) {
    %c1_i32 = arith.constant 1 : i32
    %0 = arith.muli %arg0, %c1_i32 : i32
    %1 = arith.addi %0, %arg1 : i32
    %c0_i32 = arith.constant 0 : i32
    %c0_i32_0 = arith.constant 0 : i32
    return %1, %c0_i32 : i32, i32
  }
  func.func @transform_4(%arg0: i32, %arg1: i32) -> (i32, i32) {
    %c0_i32 = arith.constant 0 : i32
    %c0_i32_0 = arith.constant 0 : i32
    %c0_i32_1 = arith.constant 0 : i32
    return %c0_i32, %c0_i32_0 : i32, i32
  }
  func.func @transform_5(%arg0: i32, %arg1: i32) -> (i32, i32) {
    %c0_i32 = arith.constant 0 : i32
    %c0_i32_0 = arith.constant 0 : i32
    %c0_i32_1 = arith.constant 0 : i32
    return %c0_i32, %c0_i32_0 : i32, i32
  }
  func.func @transform_6(%arg0: i32, %arg1: i32) -> (i32, i32) {
    %c0_i32 = arith.constant 0 : i32
    %c0_i32_0 = arith.constant 0 : i32
    %c0_i32_1 = arith.constant 0 : i32
    return %c0_i32, %c0_i32_0 : i32, i32
  }
  func.func @transform_7(%arg0: i32, %arg1: i32) -> (i32, i32) {
    %c0_i32 = arith.constant 0 : i32
    %c0_i32_0 = arith.constant 0 : i32
    %c0_i32_1 = arith.constant 0 : i32
    return %c0_i32, %c0_i32_0 : i32, i32
  }
  func.func @transform_8(%arg0: i32, %arg1: i32) -> (i32, i32) {
    %c0_i32 = arith.constant 0 : i32
    %c0_i32_0 = arith.constant 0 : i32
    %c0_i32_1 = arith.constant 0 : i32
    return %c0_i32, %c0_i32_0 : i32, i32
  }
  func.func @transform_9(%arg0: i32, %arg1: i32) -> (i32, i32) {
    %c0_i32 = arith.constant 0 : i32
    %c0_i32_0 = arith.constant 0 : i32
    %c0_i32_1 = arith.constant 0 : i32
    return %c0_i32, %c0_i32_0 : i32, i32
  }
  func.func @transform_10(%arg0: i32, %arg1: i32) -> (i32, i32) {
    %c1_i32 = arith.constant 1 : i32
    %0 = arith.muli %arg0, %c1_i32 : i32
    %1 = arith.addi %0, %arg1 : i32
    %c0_i32 = arith.constant 0 : i32
    %c0_i32_0 = arith.constant 0 : i32
    return %1, %c0_i32 : i32, i32
  }
  func.func @transform_11(%arg0: i32, %arg1: i32) -> (i32, i32, i32) {
    %c0_i32 = arith.constant 0 : i32
    %c0_i32_0 = arith.constant 0 : i32
    %c0_i32_1 = arith.constant 0 : i32
    return %arg0, %c0_i32, %c0_i32_0 : i32, i32, i32
  }
}

</mosaic_0001>

<bundles_post_ra>
// kernel: tpu_custom_call.1
= control target key start
LH: loop header
LB: loop body
LE: loop exit
PB: predicated region body
PF: predicated region fallthrough
CT: control target
= control target key end

     0   :  { %16 = vsyncpa [#allocation3], 0  ;;  %s1564_s0 = inlined_call_operand.hbm [shape: f32[2,16,128], index: 0, kind: input, shape index: {}]   ;;  %s1565_s1 = inlined_call_operand.hbm [shape: f32[2,8,128], index: 1, kind: input, shape index: {}]   ;;  %s1566_s2 = inlined_call_operand.vmem [shape: f32[8,16], index: 2, kind: input, shape index: {}]   ;;  %s1567_s3 = inlined_call_operand.vmem [shape: f32[8,1], index: 3, kind: input, shape index: {}]   ;;  %s1568_s4 = inlined_call_operand.hbm [shape: f32[128,128], index: 4, kind: input, shape index: {}]   ;;  %s1569_s5 = inlined_call_operand.vmem [shape: f32[1,128], index: 5, kind: input, shape index: {}]   ;;  %s1570_s6 = inlined_call_operand.hbm [shape: f32[128,256], index: 6, kind: input, shape index: {}]   ;;  %s1571_s7 = inlined_call_operand.vmem [shape: f32[1,256], index: 7, kind: input, shape index: {}]   ;;  %s1572_s8 = inlined_call_operand.hbm [shape: f32[128,128], index: 8, kind: input, shape index: {}]   ;;  %s1573_s9 = inlined_call_operand.vmem [shape: f32[1,128], index: 9, kind: input, shape index: {}]   ;;  %s1574_s10 = inlined_call_operand.vmem [shape: f32[8,16], index: 10, kind: input, shape index: {}]   ;;  %s1575_s11 = inlined_call_operand.hbm [shape: f32[2,16,128], index: 11, kind: output, shape index: {}]  }
   0x1   :  { %17 = vsyncpa [#allocation6], 0 }
   0x2   :  { %18 = vsyncpa [#allocation9], 0 }
   0x3   :  { %19 = vsyncpa [#allocation4], 0  ;;  %s1349_s17 = smov [#allocation5]   ;;  %s1350_s19 = smov [#allocation8]  }
   0x4   :  { %s40_s18 = sshll.u32 %s1349_s17, 4  ;;  %s82_s20 = sshll.u32 %s1350_s19, 4  ;;  %s41_s18 = int_to_ptr.vmem [resolvable:$true] %s40_s18  ;;  %s1423_s20 = int_to_ptr.vmem [resolvable:$true] %s82_s20 }
   0x5   :  { %s1209_s23 = scalar_lea.hbm %s1565_s1, 256 }
   0x6   :  { %p1210_p0 = scmp.ne.s32.totalorder %s1565_s1, %s1209_s23  ;;  %p1213_p1 = scmp.lt.u32.totalorder %s1209_s23, %s1565_s1 }
   0x8   :  { %p1215_p2 = pnand %p1213_p1, %p1210_p0 }
   0xa   :  { %1218 = shalt.err (!%p1215_p2)
}
   0xb   :  { %s1219_s28 = scalar_lea.vmem %s41_s18, 256  ;;  %p1224_p4 = scmp.lt.s32.totalorder %s41_s18, %s41_s18 }
   0xc   :  { %p1220_p3 = scmp.ne.s32.totalorder %s41_s18, %s1219_s28  ;;  %p1225_p5 = scmp.lt.s32.totalorder %s1219_s28, %s1219_s28 }
   0xe   :  { %p1226_p6 = por %p1225_p5, %p1224_p4 }
  0x10   :  { %p1227_p7 = pnand %p1226_p6, %p1220_p3 }
  0x12   :  { %1230 = shalt.err (!%p1227_p7)
}
  0x13   :  { %s1351_s29 = smov 128   ;;  %s1352_s30 = smov 8  }
  0x14   :  { %46 = dma.hbm_to_vmem [thread:$0]  %s1565_s1, 256, %s41_s18, [#allocation6], %s1351_s29, %s1351_s29, %s1352_s30  }
  0x15   :  { %s1231_s16 = scalar_lea.hbm %s1570_s6, 4096 }
  0x16   :  { %p1232_p8 = scmp.ne.s32.totalorder %s1570_s6, %s1231_s16  ;;  %p1235_p9 = scmp.lt.u32.totalorder %s1231_s16, %s1570_s6 }
  0x18   :  { %p1237_p10 = pnand %p1235_p9, %p1232_p8 }
  0x1a   :  { %1240 = shalt.err (!%p1237_p10)
}
  0x1b   :  { %s1241_s23 = scalar_lea.vmem %s1423_s20, 4096  ;;  %p1246_p12 = scmp.lt.s32.totalorder %s1423_s20, %s1423_s20 }
  0x1c   :  { %p1242_p11 = scmp.ne.s32.totalorder %s1423_s20, %s1241_s23  ;;  %p1247_p13 = scmp.lt.s32.totalorder %s1241_s23, %s1241_s23 }
  0x1e   :  { %p1248_p0 = por %p1247_p13, %p1246_p12 }
  0x20   :  { %p1249_p1 = pnand %p1248_p0, %p1242_p11 }
  0x22   :  { %1252 = shalt.err (!%p1249_p1)
}
  0x23   :  { %s1353_s1 = smov 256   ;;  %s1354_s18 = smov 16  }
  0x24   :  { %88 = dma.hbm_to_vmem [thread:$0]  %s1570_s6, 4096, %s1423_s20, [#allocation9], %s1353_s1, %s1353_s1, %s1354_s18  }
  0x25   :  { %s1355_s26 = smov [#allocation2]   ;;  %s1356_s28 = smov [#allocation7]  }
  0x26   :  { %s25_s27 = sshll.u32 %s1355_s26, 4  ;;  %s68_s12 = sshll.u32 %s1356_s28, 4  ;;  %s26_s27 = int_to_ptr.vmem [resolvable:$true] %s25_s27  ;;  %s1457_s12 = int_to_ptr.vmem [resolvable:$true] %s68_s12 }
  0x27   :  { %s1253_s15 = scalar_lea.hbm %s1564_s0, 512 }
  0x28   :  { %p1254_p2 = scmp.ne.s32.totalorder %s1564_s0, %s1253_s15  ;;  %p1257_p3 = scmp.lt.u32.totalorder %s1253_s15, %s1564_s0 }
  0x2a   :  { %p1259_p4 = pnand %p1257_p3, %p1254_p2 }
  0x2c   :  { %1262 = shalt.err (!%p1259_p4)
}
  0x2d   :  { %s1263_s6 = scalar_lea.vmem %s26_s27, 512  ;;  %p1268_p6 = scmp.lt.s32.totalorder %s26_s27, %s26_s27 }
  0x2e   :  { %p1264_p5 = scmp.ne.s32.totalorder %s26_s27, %s1263_s6  ;;  %p1269_p7 = scmp.lt.s32.totalorder %s1263_s6, %s1263_s6 }
  0x30   :  { %p1270_p8 = por %p1269_p7, %p1268_p6 }
  0x32   :  { %p1271_p9 = pnand %p1270_p8, %p1264_p5 }
  0x34   :  { %1274 = shalt.err (!%p1271_p9)
}
  0x35   :  { %31 = dma.hbm_to_vmem [thread:$0]  %s1564_s0, 512, %s26_s27, [#allocation3], %s1351_s29, %s1351_s29, %s1352_s30  }
  0x36   :  { %s1275_s18 = scalar_lea.hbm %s1568_s4, 2048 }
  0x37   :  { %p1276_p10 = scmp.ne.s32.totalorder %s1568_s4, %s1275_s18  ;;  %p1279_p11 = scmp.lt.u32.totalorder %s1275_s18, %s1568_s4 }
  0x39   :  { %p1281_p12 = pnand %p1279_p11, %p1276_p10 }
  0x3b   :  { %1284 = shalt.err (!%p1281_p12)
}
  0x3c   :  { %s1285_s13 = scalar_lea.vmem %s1457_s12, 2048  ;;  %p1290_p0 = scmp.lt.s32.totalorder %s1457_s12, %s1457_s12 }
  0x3d   :  { %p1286_p13 = scmp.ne.s32.totalorder %s1457_s12, %s1285_s13  ;;  %p1291_p1 = scmp.lt.s32.totalorder %s1285_s13, %s1285_s13 }
  0x3f   :  { %p1292_p2 = por %p1291_p1, %p1290_p0 }
  0x41   :  { %p1293_p3 = pnand %p1292_p2, %p1286_p13 }
  0x43   :  { %1296 = shalt.err (!%p1293_p3)
}
  0x44   :  { %74 = dma.hbm_to_vmem [thread:$0]  %s1568_s4, 2048, %s1457_s12, [#allocation6], %s1351_s29, %s1351_s29, %s1352_s30  }
  0x45   :  { %s1357_s14 = smov [#allocation10]   ;;  %s1297_s19 = scalar_lea.hbm %s1572_s8, 2048 }
  0x46   :  { %s96_s15 = sshll.u32 %s1357_s14, 4  ;;  %p1298_p4 = scmp.ne.s32.totalorder %s1572_s8, %s1297_s19  ;;  %s97_s15 = int_to_ptr.vmem [resolvable:$true] %s96_s15 }
  0x47   :  { %p1301_p5 = scmp.lt.u32.totalorder %s1297_s19, %s1572_s8 }
  0x49   :  { %p1303_p6 = pnand %p1301_p5, %p1298_p4 }
  0x4b   :  { %1306 = shalt.err (!%p1303_p6)
}
  0x4c   :  { %s1307_s23 = scalar_lea.vmem %s97_s15, 2048  ;;  %p1312_p8 = scmp.lt.s32.totalorder %s97_s15, %s97_s15 }
  0x4d   :  { %p1308_p7 = scmp.ne.s32.totalorder %s97_s15, %s1307_s23  ;;  %p1313_p9 = scmp.lt.s32.totalorder %s1307_s23, %s1307_s23 }
  0x4f   :  { %p1314_p10 = por %p1313_p9, %p1312_p8 }
  0x51   :  { %p1315_p11 = pnand %p1314_p10, %p1308_p7 }
  0x53   :  { %1318 = shalt.err (!%p1315_p11)
}
  0x54   :  { %102 = dma.hbm_to_vmem [thread:$0]  %s1572_s8, 2048, %s97_s15, [#allocation9], %s1351_s29, %s1351_s29, %s1352_s30  }
  0x55   :  { %1341 = dma.done.wait [#allocation3], 512  }
  0x56   :  { %1342 = vsyncadd [#allocation3], 4294966784 }
  0x57   :  { %1343 = dma.done.wait [#allocation6], 2304  }
  0x58   :  { %1344 = vsyncadd [#allocation6], 4294964992 }
  0x59   :  { %1345 = dma.done.wait [#allocation9], 6144  }
  0x5a   :  { %1346 = vsyncadd [#allocation9], 4294961152  ;;  %v1358_v0 = vmov 0.0|0.0   ;;  %vm1359_vm0 = vmmov 0   ;;  %v1360_v1 = vmov 0.0   ;;  %v1361_v2 = vmov 0  }
  0x5b   :  { %1112 = vmatprep.subr.bf16.mxu1 %v1358_v0  ;;  %990 = vmatprep.mubr.msk.f32.mxu1 %vm1359_vm0, %v1360_v1  ;;  %v320_v3 = vld [vmem:[#allocation2] sm:$0xff]  ;;  %v321_v4 = vld [vmem:[#allocation2 + $0x8] sm:$0xff]  ;;  %v402_v7 = vld [vmem:[#allocation2 + $0x10] sm:$0xff]  ;;  %vm327_vm1 = vcmask 130048   ;;  %vm712_vm2 = vcmask 64512   ;;  %s1362_s13 = smov [#allocation11]  }
  0x5c   :  { %1196 = vset.pattern.permute.xlu0 %v1361_v2  ;;  %307 = vmatprep.mubr.f32.mxu0 %v1360_v1  ;;  %v1113_v5 = vpack.c.bf16 %v321_v4, %v320_v3  ;;  %v162_v6 = vld [vmem:[%s1566_s2] sm:$0xff]  ;;  %v403_v8 = vld [vmem:[#allocation2 + $0x18] sm:$0xff]  ;;  %v183_v11 = vld [vmem:[#allocation8 + $0x18] sm:$0xff]  ;;  %s898_s0 = sshll.u32 %s1362_s13, 4  ;;  %s899_s0 = int_to_ptr.vmem [resolvable:$true] %s898_s0 }
  0x5d   :  { %v163_v9 = vld [vmem:[%s1567_s3] sm:$0xff]  ;;  %v181_v10 = vld [vmem:[#allocation8 + $0x8] sm:$0xff]  ;;  %v180_v12 = vld [vmem:[#allocation8] sm:$0xff]  ;;  %v1116_v13 = vpack.c.bf16 %v403_v8, %v402_v7  ;;  %p1324_p13 = scmp.lt.s32.totalorder %s899_s0, %s899_s0 }
  0x5e   :  { %324 = vperm.xlu0 %1196, %v163_v9   ;;  %1114 = vmatpush3.bf16.msra.mxu1 %v1113_v5  ;;  %v1080_v14 = vpack.c.bf16 %v183_v11, %v181_v10  ;;  %v182_v15 = vld [vmem:[#allocation8 + $0x10] sm:$0xff]  ;;  %v164_v16 = vld [vmem:[#allocation7] sm:$0xff]  ;;  %v165_v17 = vld [vmem:[#allocation7 + $0x8] sm:$0xff] }
  0x5f   :  { %1115 = vmatprep.subr.bf16.mxu1 %v1358_v0  ;;  %v1082_v18 = vpack.c.bf16 %v182_v15, %v180_v12  ;;  %v1118_v19 = vpack.c.bf16 %v165_v17, %v164_v16  ;;  %v185_v20 = vld [vmem:[#allocation8 + $0x28] sm:$0xff]  ;;  %v187_v21 = vld [vmem:[#allocation8 + $0x38] sm:$0xff]  ;;  %v184_v22 = vld [vmem:[#allocation8 + $0x20] sm:$0xff] }
  0x60   :  { %1081 = vmatprep.subr.bf16.mxu0 %v1080_v14  ;;  %v1084_v23 = vpack.c.bf16 %v187_v21, %v185_v20  ;;  %v186_v24 = vld [vmem:[#allocation8 + $0x30] sm:$0xff]  ;;  %v167_v26 = vld [vmem:[#allocation7 + $0x18] sm:$0xff]  ;;  %v189_v28 = vld [vmem:[#allocation8 + $0x48] sm:$0xff] }
  0x61   :  { %v166_v25 = vld [vmem:[#allocation7 + $0x10] sm:$0xff]  ;;  %991 = vmatmul.mubr.msk.f32.vlgmr.msra.gmra.mrb[0].mxu1 %vm327_vm1, %v162_v6  ;;  %1083 = vmatpush1.bf16.msra.mxu0 %v1082_v18  ;;  %v1086_v27 = vpack.c.bf16 %v186_v24, %v184_v22  ;;  %v191_v29 = vld [vmem:[#allocation8 + $0x58] sm:$0xff]  ;;  %v188_v31 = vld [vmem:[#allocation8 + $0x40] sm:$0xff] }
  0x62   :  { %1117 = vmatpush3.bf16.msra.mxu1 %v1116_v13  ;;  %997 = vmatprep.mubr.msk.f32.mxu1 %vm1359_vm0, %v1360_v1  ;;  %v1088_v30 = vpack.c.bf16 %v191_v29, %v189_v28  ;;  %v190_v32 = vld [vmem:[#allocation8 + $0x50] sm:$0xff]  ;;  %v1122_v33 = vpack.c.bf16 %v167_v26, %v166_v25  ;;  %v193_v34 = vld [vmem:[#allocation8 + $0x68] sm:$0xff]  ;;  %v195_v35 = vld [vmem:[#allocation8 + $0x78] sm:$0xff] }
  0x63   :  { %1119 = vmatprep.subr.bf16.mxu1 %v1118_v19  ;;  %1085 = vmatprep.subr.bf16.mxu0 %v1084_v23  ;;  %v168_v36 = vld [vmem:[#allocation7 + $0x20] sm:$0xff]  ;;  %v169_v37 = vld [vmem:[#allocation7 + $0x28] sm:$0xff]  ;;  %v1090_v38 = vpack.c.bf16 %v190_v32, %v188_v31  ;;  %v1092_v39 = vpack.c.bf16 %v195_v35, %v193_v34  ;;  %v194_v41 = vld [vmem:[#allocation8 + $0x70] sm:$0xff] }
  0x64   :  { %v192_v40 = vld [vmem:[#allocation8 + $0x60] sm:$0xff]  ;;  %v1126_v42 = vpack.c.bf16 %v169_v37, %v168_v36  ;;  %v197_v43 = vld [vmem:[#allocation8 + $0x88] sm:$0xff]  ;;  %v199_v44 = vld [vmem:[#allocation8 + $0x98] sm:$0xff] }
  0x65   :  { %998 = vmatmul.mubr.msk.f32.vlgmr.msra.gmra.mrb[2].mxu1 %vm327_vm1, %v162_v6  ;;  %1087 = vmatpush1.bf16.msra.mxu0 %v1086_v27  ;;  %v170_v45 = vld [vmem:[#allocation7 + $0x30] sm:$0xff]  ;;  %v171_v46 = vld [vmem:[#allocation7 + $0x38] sm:$0xff]  ;;  %v1094_v47 = vpack.c.bf16 %v194_v41, %v192_v40  ;;  %v1096_v48 = vpack.c.bf16 %v199_v44, %v197_v43  ;;  %v196_v49 = vld [vmem:[#allocation8 + $0x80] sm:$0xff] }
  0x66   :  { %1121 = vmatpush3.bf16.msra.mxu1 %v1118_v19  ;;  %1089 = vmatprep.subr.bf16.mxu0 %v1088_v30  ;;  %v198_v50 = vld [vmem:[#allocation8 + $0x90] sm:$0xff]  ;;  %v1130_v51 = vpack.c.bf16 %v171_v46, %v170_v45  ;;  %v201_v52 = vld [vmem:[#allocation8 + $0xa8] sm:$0xff]  ;;  %v203_v53 = vld [vmem:[#allocation8 + $0xb8] sm:$0xff] }
  0x67   :  { %1123 = vmatprep.subr.bf16.mxu1 %v1122_v33  ;;  %v172_v54 = vld [vmem:[#allocation7 + $0x40] sm:$0xff]  ;;  %v173_v55 = vld [vmem:[#allocation7 + $0x48] sm:$0xff]  ;;  %v1098_v56 = vpack.c.bf16 %v198_v50, %v196_v49  ;;  %v1100_v57 = vpack.c.bf16 %v203_v53, %v201_v52  ;;  %v202_v59 = vld [vmem:[#allocation8 + $0xb0] sm:$0xff] }
  0x68   :  { %v200_v58 = vld [vmem:[#allocation8 + $0xa0] sm:$0xff]  ;;  %v1134_v60 = vpack.c.bf16 %v173_v55, %v172_v54  ;;  %v205_v61 = vld [vmem:[#allocation8 + $0xc8] sm:$0xff]  ;;  %v207_v62 = vld [vmem:[#allocation8 + $0xd8] sm:$0xff] }
  0x69   :  { %1091 = vmatpush1.bf16.msra.mxu0 %v1090_v38  ;;  %v174_v63 = vld [vmem:[#allocation7 + $0x50] sm:$0xff]  ;;  %v175_v0 = vld [vmem:[#allocation7 + $0x58] sm:$0xff]  ;;  %v1102_v2 = vpack.c.bf16 %v202_v59, %v200_v58  ;;  %v1104_v3 = vpack.c.bf16 %v207_v62, %v205_v61  ;;  %v204_v4 = vld [vmem:[#allocation8 + $0xc0] sm:$0xff] }
  0x6a   :  { %1125 = vmatpush3.bf16.msra.mxu1 %v1122_v33  ;;  %1093 = vmatprep.subr.bf16.mxu0 %v1092_v39  ;;  %v206_v5 = vld [vmem:[#allocation8 + $0xd0] sm:$0xff]  ;;  %v1138_v6 = vpack.c.bf16 %v175_v0, %v174_v63  ;;  %v176_v7 = vld [vmem:[#allocation7 + $0x60] sm:$0xff]  ;;  %v177_v8 = vld [vmem:[#allocation7 + $0x68] sm:$0xff]  ;;  %v233_v33 = vlaneseq }
  0x6b   :  { %1127 = vmatprep.subr.bf16.mxu1 %v1126_v42  ;;  %v1106_v9 = vpack.c.bf16 %v206_v5, %v204_v4  ;;  %v1142_v10 = vpack.c.bf16 %v177_v8, %v176_v7  ;;  %v209_v11 = vld [vmem:[#allocation8 + $0xe8] sm:$0xff]  ;;  %v211_v12 = vld [vmem:[#allocation8 + $0xf8] sm:$0xff]  ;;  %v208_v14 = vld [vmem:[#allocation8 + $0xe0] sm:$0xff] }
  0x6c   :  { %v1108_v13 = vpack.c.bf16 %v211_v12, %v209_v11  ;;  %v210_v15 = vld [vmem:[#allocation8 + $0xf0] sm:$0xff]  ;;  %v179_v18 = vld [vmem:[#allocation7 + $0x78] sm:$0xff]  ;;  %v1527_v34 = vshrl.u32 %v233_v33, 7  ;;  %v212_v50 = vld [vmem:[#allocation10] sm:$0xff] }
  0x6d   :  { %1095 = vmatpush1.bf16.msra.mxu0 %v1094_v47  ;;  %v1110_v16 = vpack.c.bf16 %v210_v15, %v208_v14  ;;  %v178_v17 = vld [vmem:[#allocation7 + $0x70] sm:$0xff]  ;;  %v230_v21 = vld [vmem:[#allocation5 + $0x8] sm:$0xff]  ;;  %v220_v62 = vld [vmem:[#allocation10 + $0x40] sm:$0xff] }
  0x6e   :  { %1129 = vmatpush3.bf16.msra.mxu1 %v1126_v42  ;;  %1097 = vmatprep.subr.bf16.mxu0 %v1096_v48  ;;  %v1146_v19 = vpack.c.bf16 %v179_v18, %v178_v17  ;;  %v229_v20 = vld [vmem:[#allocation5] sm:$0xff]  ;;  %v215_v54 = vld [vmem:[#allocation10 + $0x18] sm:$0xff]  ;;  %v221_v63 = vld [vmem:[#allocation10 + $0x48] sm:$0xff] }
  0x6f   :  { %1131 = vmatprep.subr.bf16.mxu1 %v1130_v51  ;;  %v1533_v35 = vld [vmem:[%s1571_s7] sm:$0x3]  ;;  %v1166_v0 = vpack.c.bf16 %v221_v63, %v220_v62  ;;  %v224_v5 = vld [vmem:[#allocation10 + $0x60] sm:$0xff] }
  0x70   :  { %v932_v37 = vld [vmem:[%s1569_s5] ss:$0 sm:$0xff] }
  0x71   :  { %1099 = vmatpush1.bf16.msra.mxu0 %v1098_v56  ;;  %v214_v53 = vld [vmem:[#allocation10 + $0x10] sm:$0xff]  ;;  %v216_v56 = vld [vmem:[#allocation10 + $0x20] sm:$0xff] }
  0x72   :  { %1133 = vmatpush3.bf16.msra.mxu1 %v1130_v51  ;;  %1101 = vmatprep.subr.bf16.mxu0 %v1100_v57  ;;  %v213_v51 = vld [vmem:[#allocation10 + $0x8] sm:$0xff]  ;;  %v1154_v55 = vpack.c.bf16 %v215_v54, %v214_v53  ;;  %v218_v59 = vld [vmem:[#allocation10 + $0x30] sm:$0xff] }
  0x73   :  { %1135 = vmatprep.subr.bf16.mxu1 %v1134_v60  ;;  %v1150_v52 = vpack.c.bf16 %v213_v51, %v212_v50  ;;  %v217_v57 = vld [vmem:[#allocation10 + $0x28] sm:$0xff]  ;;  %v226_v8 = vld [vmem:[#allocation10 + $0x70] sm:$0xff] }
  0x74   :  { %v1158_v58 = vpack.c.bf16 %v217_v57, %v216_v56  ;;  %v228_v11 = vld [vmem:[%s1574_s10] sm:$0xff] }
  0x75   :  { %1103 = vmatpush1.bf16.msra.mxu0 %v1102_v2  ;;  %v222_v2 = vld [vmem:[#allocation10 + $0x50] sm:$0xff] }
  0x76   :  { %1137 = vmatpush3.bf16.msra.mxu1 %v1134_v60  ;;  %1105 = vmatprep.subr.bf16.mxu0 %v1104_v3  ;;  %v219_v60 = vld [vmem:[#allocation10 + $0x38] sm:$0xff] }
  0x77   :  { %1139 = vmatprep.subr.bf16.mxu1 %v1138_v6  ;;  %v1162_v61 = vpack.c.bf16 %v219_v60, %v218_v59  ;;  %v223_v3 = vld [vmem:[#allocation10 + $0x58] sm:$0xff] }
  0x78   :  { %v1170_v4 = vpack.c.bf16 %v223_v3, %v222_v2 }
  0x79   :  { %1107 = vmatpush1.bf16.msra.mxu0 %v1106_v9  ;;  %v227_v9 = vld [vmem:[#allocation10 + $0x78] sm:$0xff] }
  0x7a   :  { %1141 = vmatpush3.bf16.msra.mxu1 %v1138_v6  ;;  %1109 = vmatprep.subr.bf16.mxu0 %v1108_v13  ;;  %v225_v6 = vld [vmem:[#allocation10 + $0x68] sm:$0xff] }
  0x7b   :  { %1143 = vmatprep.subr.bf16.mxu1 %v1142_v10  ;;  %v1174_v7 = vpack.c.bf16 %v225_v6, %v224_v5 }
  0x7d   :  { %1111 = vmatpush1.bf16.msra.mxu0 %v1110_v16 }
  0x7e   :  { %1145 = vmatpush3.bf16.msra.mxu1 %v1142_v10  ;;  %1151 = vmatprep.subr.bf16.mxu0 %v1150_v52  ;;  %v1178_v10 = vpack.c.bf16 %v227_v9, %v226_v8 }
  0x7f   :  { %1147 = vmatprep.subr.bf16.mxu1 %v1146_v19 }
  0x80   :  { %308 = vmatmul.mubr.f32.vlgmr.msra.gmra.mrb[0].mxu0 %v229_v20 }
  0x81   :  { %313 = vmatprep.mubr.f32.mxu0 %v1360_v1  ;;  %v235_v1 = vsub.s32 0, %v1527_v34  ;;  %1153 = vmatpush3.bf16.msra.mxu0 %v1150_v52 }
  0x82   :  { %1149 = vmatpush3.bf16.msra.mxu1 %v1146_v19  ;;  %1155 = vmatprep.subr.bf16.mxu0 %v1154_v55 }
  0x83   :  { %v236_v36 = vrot.slane %v1533_v35, %v235_v1  ;;  %v239_v1 = vsub.s32 1, %v1527_v34 }
  0x84   :  { %314 = vmatmul.mubr.f32.gmra.mrb[2].mxu0 %v230_v21 }
  0x85   :  { %1157 = vmatpush3.bf16.msra.mxu0 %v1154_v55 }
  0x86   :  { %1159 = vmatprep.subr.bf16.mxu0 %v1158_v58 }
  0x89   :  { %1161 = vmatpush3.bf16.msra.mxu0 %v1158_v58 }
  0x8a   :  { %1163 = vmatprep.subr.bf16.mxu0 %v1162_v61 }
  0x8d   :  { %1165 = vmatpush3.bf16.msra.mxu0 %v1162_v61 }
  0x8e   :  { %1167 = vmatprep.subr.bf16.mxu0 %v1166_v0 }
  0x91   :  { %1169 = vmatpush3.bf16.msra.mxu0 %v1166_v0 }
  0x92   :  { %1171 = vmatprep.subr.bf16.mxu0 %v1170_v4 }
  0x95   :  { %1173 = vmatpush3.bf16.msra.mxu0 %v1170_v4 }
  0x96   :  { %1175 = vmatprep.subr.bf16.mxu0 %v1174_v7 }
  0x99   :  { %1177 = vmatpush3.bf16.msra.mxu0 %v1174_v7 }
  0x9a   :  { %1179 = vmatprep.subr.bf16.mxu0 %v1178_v10 }
  0x9d   :  { %1181 = vmatpush3.bf16.msra.mxu0 %v1178_v10 }
  0xdd   :  { %v325_v22 = vpop.permute.xlu0 %324 }
 0x134   :  { %v397_v23 = vpop.f32.mrb[0].mxu1 }
 0x135   :  { %v398_v24 = vadd.f32 %v397_v23, %v325_v22  ;;  %v992_v25 = vpop.f32.mrb[1].mxu1 }
 0x137   :  { %1032 = vmatprep.mubr.f32.mxu1 %v398_v24 }
 0x138   :  { %v470_v26 = vpop.f32.mrb[2].mxu1 }
 0x139   :  { %v471_v27 = vadd.f32 %v470_v26, %v325_v22  ;;  %v999_v28 = vpop.f32.mrb[3].mxu1 }
 0x13b   :  { %1033 = vmatmul.mubr.f32.vlgmr.msra.gmra.mrb[4].mxu1 %v471_v27 }
 0x153   :  { %v309_v29 = vpop.f32.mrb[0].mxu0 }
 0x154   :  { %v1523_v30 = vpop.f32.mrb[1].mxu0  ;;  %v310_v39 = vadd.f32 %v309_v29, %v236_v36 }
 0x157   :  { %v315_v31 = vpop.f32.mrb[2].mxu0 }
 0x158   :  { %v1525_v32 = vpop.f32.mrb[3].mxu0  ;;  %v316_v42 = vadd.f32 %v315_v31, %v236_v36  ;;  %v240_v36 = vrot.slane %v1533_v35, %v239_v1 }
 0x20e   :  { %v1034_v38 = vpop.f32.mrb[4].mxu1 }
 0x20f   :  { %v553_v40 = vadd.f32 %v1034_v38, %v932_v37  ;;  %v547_v41 = vpop.f32.mrb[5].mxu1  ;;  %v312_v38 = vadd.f32 %v1523_v30, %v240_v36  ;;  %v933_v30 = vld [vmem:[%s1573_s9] ss:$0 sm:$0xff]  ;;  %s1319_s9 = scalar_lea.vmem %s899_s0, 512 }
 0x210   :  { %v548_v43 = vadd.f32 %v932_v37, %v547_v41  ;;  %p1320_p12 = scmp.ne.s32.totalorder %s899_s0, %s1319_s9  ;;  %p1325_p0 = scmp.lt.s32.totalorder %s1319_s9, %s1319_s9 }
 0x211   :  { %v557_v44 = vmul.f32 0.088388346, %v553_v40 }
 0x212   :  { %v556_v45 = vmul.f32 0.088388346, %v548_v43  ;;  %p1326_p1 = por %p1325_p0, %p1324_p13 }
 0x213   :  { %v578_v46 = vmul.f32 %v557_v44, %v310_v39  ;;  %v581_v47 = vmul.f32 %v557_v44, %v316_v42 }
 0x214   :  { %v558_v48 = vmul.f32 %v556_v45, %v310_v39  ;;  %v561_v49 = vmul.f32 %v556_v45, %v316_v42  ;;  %v318_v39 = vadd.f32 %v1525_v32, %v240_v36  ;;  %p1327_p2 = pnand %p1326_p1, %p1320_p12 }
 0x215   :  { %579 = vadd.xlane.f32.xlu1 %v578_v46 }
 0x216   :  { %559 = vadd.xlane.f32.xlu0 %v558_v48 }
 0x219   :  { %562 = vadd.xlane.f32.xlu1 %v561_v49 }
 0x21d   :  { %582 = vadd.xlane.f32.xlu1 %v581_v47 }
 0x250   :  { %680 = vxpose.xlu1.b32.start.end [1/1] (short) (narrow) %v228_v11, 16 }
 0x2a2   :  { %v580_v12 = vpop.xlane.xlu1 %579 }
 0x2a3   :  { %v560_v13 = vpop.xlane.xlu0 %559 }
 0x2a6   :  { %v563_v14 = vpop.xlane.xlu1 %562 }
 0x2a7   :  { %v564_v15 = vmax.f32 %v560_v13, %v563_v14 }
 0x2a9   :  { %v565_v16 = vsub.f32 %v560_v13, %v564_v15  ;;  %v568_v17 = vsub.f32 %v563_v14, %v564_v15 }
 0x2aa   :  { %v583_v18 = vpop.xlane.xlu1 %582 }
 0x2ab   :  { %v566_v19 = vmul.f32 1.442695, %v565_v16  ;;  %v569_v20 = vmul.f32 1.442695, %v568_v17  ;;  %v584_v21 = vmax.f32 %v580_v12, %v583_v18 }
 0x2ad   :  { %1197 = vpow2.f32 %v566_v19  ;;  %v585_v22 = vsub.f32 %v580_v12, %v584_v21  ;;  %v588_v23 = vsub.f32 %v583_v18, %v584_v21 }
 0x2ae   :  { %1199 = vpow2.f32 %v569_v20 }
 0x2af   :  { %v586_v24 = vmul.f32 1.442695, %v585_v22  ;;  %v589_v25 = vmul.f32 1.442695, %v588_v23 }
 0x2b1   :  { %1201 = vpow2.f32 %v586_v24 }
 0x2b2   :  { %1203 = vpow2.f32 %v589_v25 }
 0x2b7   :  { %v1198_v26 = vpop.eup %1197 }
 0x2b8   :  { %v1200_v27 = vpop.eup %1199 }
 0x2b9   :  { %v571_v28 = vadd.f32 %v1200_v27, %v1198_v26 }
 0x2bb   :  { %v1202_v29 = vpop.eup %1201  ;;  %1205 = vrcp.f32 %v571_v28 }
 0x2bc   :  { %v1204_v31 = vpop.eup %1203 }
 0x2bd   :  { %v591_v33 = vadd.f32 %v1204_v31, %v1202_v29 }
 0x2bf   :  { %1207 = vrcp.f32 %v591_v33 }
 0x2c5   :  { %v1206_v37 = vpop.eup %1205 }
 0x2c6   :  { %v573_v40 = vmul.f32 %v1206_v37, %v1198_v26  ;;  %v575_v41 = vmul.f32 %v1206_v37, %v1200_v27 }
 0x2c8   :  { %v574_v42 = vmul.f32 %v573_v40, %v312_v38  ;;  %v576_v43 = vmul.f32 %v575_v41, %v318_v39 }
 0x2c9   :  { %v1208_v44 = vpop.eup %1207 }
 0x2ca   :  { %v593_v45 = vmul.f32 %v1208_v44, %v1202_v29  ;;  %v595_v46 = vmul.f32 %v1208_v44, %v1204_v31  ;;  %v577_v47 = vadd.f32 %v576_v43, %v574_v42 }
 0x2cc   :  { %1067 = vmatprep.mubr.f32.mxu0 %v577_v47  ;;  %v594_v48 = vmul.f32 %v593_v45, %v312_v38  ;;  %v596_v49 = vmul.f32 %v595_v46, %v318_v39 }
 0x2ce   :  { %v597_v34 = vadd.f32 %v596_v49, %v594_v48 }
 0x2d0   :  { %1068 = vmatmul.mubr.f32.vlgmr.msra.gmra.mrb[4].mxu0 %v597_v34  ;;  %v696_v50 = vpop.trf.xlu1 }
 0x2d1   :  { %1072 = vmatprep.mubr.msk.f32.mxu1 %vm712_vm2, %v696_v50 }
 0x2d4   :  { %v697_v52 = vpop.trf.xlu1 }
 0x3a3   :  { %v1069_v32 = vpop.f32.mrb[4].mxu0 }
 0x3a4   :  { %v671_v35 = vpop.f32.mrb[5].mxu0  ;;  %v677_v53 = vadd.f32 %v1069_v32, %v933_v30 }
 0x3a5   :  { %v672_v51 = vadd.f32 %v933_v30, %v671_v35 }
 0x3a7   :  { %1070 = vmatprep.subr.mxu1 %v672_v51 }
 0x3a8   :  { %1071 = vmatpush3.msra.mxu1 %v672_v51 }
 0x3a9   :  { %1073 = vmatmul.mubr.msk.f32.vlgmr.msra.gmra.mrb[6].mxu1 %vm712_vm2, %v697_v52  ;;  %1075 = vmatprep.subr.mxu1 %v677_v53 }
 0x3aa   :  { %1076 = vmatpush3.msra.mxu1 %v677_v53  ;;  %1077 = vmatprep.mubr.msk.f32.mxu1 %vm712_vm2, %v696_v50 }
 0x3ad   :  { %1078 = vmatmul.mubr.msk.f32.vlgmr.msra.gmra.mrb[8].mxu1 %vm712_vm2, %v697_v52 }
 0x47c   :  { %v1074_v54 = vpop.f32.mrb[6].mxu1 }
 0x47d   :  { %874 = vst [vmem:[#allocation11 + $0x8] sm:$0xff] %v1074_v54  ;;  %v785_v55 = vpop.f32.mrb[7].mxu1 }
 0x47e   :  { %873 = vst [vmem:[#allocation11] sm:$0xff] %v785_v55 }
 0x480   :  { %v1079_v56 = vpop.f32.mrb[8].mxu1 }
 0x481   :  { %876 = vst [vmem:[#allocation11 + $0x18] sm:$0xff] %v1079_v56  ;;  %v860_v57 = vpop.f32.mrb[9].mxu1 }
 0x482   :  { %875 = vst [vmem:[#allocation11 + $0x10] sm:$0xff] %v860_v57 }
 0x483   :  { %1330 = shalt.err (!%p1327_p2)
}
 0x484   :  { %s1331_s15 = scalar_lea.hbm %s1575_s11, 512 }
 0x485   :  { %p1332_p3 = scmp.ne.s32.totalorder %s1575_s11, %s1331_s15  ;;  %p1335_p4 = scmp.lt.u32.totalorder %s1331_s15, %s1575_s11 }
 0x487   :  { %p1337_p5 = pnand %p1335_p4, %p1332_p3 }
 0x489   :  { %1340 = shalt.err (!%p1337_p5)
}
 0x48a   :  { %904 = dma.vmem_to_hbm [thread:$0]  %s899_s0, 512, %s1575_s11, [#allocation4], %s1351_s29, %s1351_s29, %s1352_s30  }
 0x48b   :  { %1347 = dma.done.wait [#allocation4], 512  }
 0x48c   :  { %1348 = vsyncadd [#allocation4], 4294966784 }
 0x48d   :  { %908 = vsyncpa [#allocation3], 1 }
 0x48e   :  { %909 = vsyncpa [#allocation6], 1 }
 0x48f   :  { %910 = vsyncpa [#allocation9], 1 }
 0x490   :  { %911 = vsyncpa [#allocation4], 1 }

// kernel: tpu_custom_call.1
= control target key start
LH: loop header
LB: loop body
LE: loop exit
PB: predicated region body
PF: predicated region fallthrough
CT: control target
= control target key end

     0   :  { %16 = vsyncpa [#allocation3], 0  ;;  %s1564_s0 = inlined_call_operand.hbm [shape: f32[2,16,128], index: 0, kind: input, shape index: {}]   ;;  %s1565_s1 = inlined_call_operand.hbm [shape: f32[2,8,128], index: 1, kind: input, shape index: {}]   ;;  %s1566_s2 = inlined_call_operand.vmem [shape: f32[8,16], index: 2, kind: input, shape index: {}]   ;;  %s1567_s3 = inlined_call_operand.vmem [shape: f32[8,1], index: 3, kind: input, shape index: {}]   ;;  %s1568_s4 = inlined_call_operand.hbm [shape: f32[128,128], index: 4, kind: input, shape index: {}]   ;;  %s1569_s5 = inlined_call_operand.vmem [shape: f32[1,128], index: 5, kind: input, shape index: {}]   ;;  %s1570_s6 = inlined_call_operand.hbm [shape: f32[128,256], index: 6, kind: input, shape index: {}]   ;;  %s1571_s7 = inlined_call_operand.vmem [shape: f32[1,256], index: 7, kind: input, shape index: {}]   ;;  %s1572_s8 = inlined_call_operand.hbm [shape: f32[128,128], index: 8, kind: input, shape index: {}]   ;;  %s1573_s9 = inlined_call_operand.vmem [shape: f32[1,128], index: 9, kind: input, shape index: {}]   ;;  %s1574_s10 = inlined_call_operand.vmem [shape: f32[8,16], index: 10, kind: input, shape index: {}]   ;;  %s1575_s11 = inlined_call_operand.hbm [shape: f32[2,16,128], index: 11, kind: output, shape index: {}]  }
   0x1   :  { %17 = vsyncpa [#allocation6], 0 }
   0x2   :  { %18 = vsyncpa [#allocation9], 0 }
   0x3   :  { %19 = vsyncpa [#allocation4], 0  ;;  %s1349_s17 = smov [#allocation5]   ;;  %s1350_s19 = smov [#allocation8]  }
   0x4   :  { %s40_s18 = sshll.u32 %s1349_s17, 4  ;;  %s82_s20 = sshll.u32 %s1350_s19, 4  ;;  %s41_s18 = int_to_ptr.vmem [resolvable:$true] %s40_s18  ;;  %s1423_s20 = int_to_ptr.vmem [resolvable:$true] %s82_s20 }
   0x5   :  { %s1209_s23 = scalar_lea.hbm %s1565_s1, 256 }
   0x6   :  { %p1210_p0 = scmp.ne.s32.totalorder %s1565_s1, %s1209_s23  ;;  %p1213_p1 = scmp.lt.u32.totalorder %s1209_s23, %s1565_s1 }
   0x8   :  { %p1215_p2 = pnand %p1213_p1, %p1210_p0 }
   0xa   :  { %1218 = shalt.err (!%p1215_p2)
}
   0xb   :  { %s1219_s28 = scalar_lea.vmem %s41_s18, 256  ;;  %p1224_p4 = scmp.lt.s32.totalorder %s41_s18, %s41_s18 }
   0xc   :  { %p1220_p3 = scmp.ne.s32.totalorder %s41_s18, %s1219_s28  ;;  %p1225_p5 = scmp.lt.s32.totalorder %s1219_s28, %s1219_s28 }
   0xe   :  { %p1226_p6 = por %p1225_p5, %p1224_p4 }
  0x10   :  { %p1227_p7 = pnand %p1226_p6, %p1220_p3 }
  0x12   :  { %1230 = shalt.err (!%p1227_p7)
}
  0x13   :  { %s1351_s29 = smov 128   ;;  %s1352_s30 = smov 8  }
  0x14   :  { %46 = dma.hbm_to_vmem [thread:$0]  %s1565_s1, 256, %s41_s18, [#allocation6], %s1351_s29, %s1351_s29, %s1352_s30  }
  0x15   :  { %s1231_s16 = scalar_lea.hbm %s1570_s6, 4096 }
  0x16   :  { %p1232_p8 = scmp.ne.s32.totalorder %s1570_s6, %s1231_s16  ;;  %p1235_p9 = scmp.lt.u32.totalorder %s1231_s16, %s1570_s6 }
  0x18   :  { %p1237_p10 = pnand %p1235_p9, %p1232_p8 }
  0x1a   :  { %1240 = shalt.err (!%p1237_p10)
}
  0x1b   :  { %s1241_s23 = scalar_lea.vmem %s1423_s20, 4096  ;;  %p1246_p12 = scmp.lt.s32.totalorder %s1423_s20, %s1423_s20 }
  0x1c   :  { %p1242_p11 = scmp.ne.s32.totalorder %s1423_s20, %s1241_s23  ;;  %p1247_p13 = scmp.lt.s32.totalorder %s1241_s23, %s1241_s23 }
  0x1e   :  { %p1248_p0 = por %p1247_p13, %p1246_p12 }
  0x20   :  { %p1249_p1 = pnand %p1248_p0, %p1242_p11 }
  0x22   :  { %1252 = shalt.err (!%p1249_p1)
}
  0x23   :  { %s1353_s1 = smov 256   ;;  %s1354_s18 = smov 16  }
  0x24   :  { %88 = dma.hbm_to_vmem [thread:$0]  %s1570_s6, 4096, %s1423_s20, [#allocation9], %s1353_s1, %s1353_s1, %s1354_s18  }
  0x25   :  { %s1355_s26 = smov [#allocation2]   ;;  %s1356_s28 = smov [#allocation7]  }
  0x26   :  { %s25_s27 = sshll.u32 %s1355_s26, 4  ;;  %s68_s12 = sshll.u32 %s1356_s28, 4  ;;  %s26_s27 = int_to_ptr.vmem [resolvable:$true] %s25_s27  ;;  %s1457_s12 = int_to_ptr.vmem [resolvable:$true] %s68_s12 }
  0x27   :  { %s1253_s15 = scalar_lea.hbm %s1564_s0, 512 }
  0x28   :  { %p1254_p2 = scmp.ne.s32.totalorder %s1564_s0, %s1253_s15  ;;  %p1257_p3 = scmp.lt.u32.totalorder %s1253_s15, %s1564_s0 }
  0x2a   :  { %p1259_p4 = pnand %p1257_p3, %p1254_p2 }
  0x2c   :  { %1262 = shalt.err (!%p1259_p4)
}
  0x2d   :  { %s1263_s6 = scalar_lea.vmem %s26_s27, 512  ;;  %p1268_p6 = scmp.lt.s32.totalorder %s26_s27, %s26_s27 }
  0x2e   :  { %p1264_p5 = scmp.ne.s32.totalorder %s26_s27, %s1263_s6  ;;  %p1269_p7 = scmp.lt.s32.totalorder %s1263_s6, %s1263_s6 }
  0x30   :  { %p1270_p8 = por %p1269_p7, %p1268_p6 }
  0x32   :  { %p1271_p9 = pnand %p1270_p8, %p1264_p5 }
  0x34   :  { %1274 = shalt.err (!%p1271_p9)
}
  0x35   :  { %31 = dma.hbm_to_vmem [thread:$0]  %s1564_s0, 512, %s26_s27, [#allocation3], %s1351_s29, %s1351_s29, %s1352_s30  }
  0x36   :  { %s1275_s18 = scalar_lea.hbm %s1568_s4, 2048 }
  0x37   :  { %p1276_p10 = scmp.ne.s32.totalorder %s1568_s4, %s1275_s18  ;;  %p1279_p11 = scmp.lt.u32.totalorder %s1275_s18, %s1568_s4 }
  0x39   :  { %p1281_p12 = pnand %p1279_p11, %p1276_p10 }
  0x3b   :  { %1284 = shalt.err (!%p1281_p12)
}
  0x3c   :  { %s1285_s13 = scalar_lea.vmem %s1457_s12, 2048  ;;  %p1290_p0 = scmp.lt.s32.totalorder %s1457_s12, %s1457_s12 }
  0x3d   :  { %p1286_p13 = scmp.ne.s32.totalorder %s1457_s12, %s1285_s13  ;;  %p1291_p1 = scmp.lt.s32.totalorder %s1285_s13, %s1285_s13 }
  0x3f   :  { %p1292_p2 = por %p1291_p1, %p1290_p0 }
  0x41   :  { %p1293_p3 = pnand %p1292_p2, %p1286_p13 }
  0x43   :  { %1296 = shalt.err (!%p1293_p3)
}
  0x44   :  { %74 = dma.hbm_to_vmem [thread:$0]  %s1568_s4, 2048, %s1457_s12, [#allocation6], %s1351_s29, %s1351_s29, %s1352_s30  }
  0x45   :  { %s1357_s14 = smov [#allocation10]   ;;  %s1297_s19 = scalar_lea.hbm %s1572_s8, 2048 }
  0x46   :  { %s96_s15 = sshll.u32 %s1357_s14, 4  ;;  %p1298_p4 = scmp.ne.s32.totalorder %s1572_s8, %s1297_s19  ;;  %s97_s15 = int_to_ptr.vmem [resolvable:$true] %s96_s15 }
  0x47   :  { %p1301_p5 = scmp.lt.u32.totalorder %s1297_s19, %s1572_s8 }
  0x49   :  { %p1303_p6 = pnand %p1301_p5, %p1298_p4 }
  0x4b   :  { %1306 = shalt.err (!%p1303_p6)
}
  0x4c   :  { %s1307_s23 = scalar_lea.vmem %s97_s15, 2048  ;;  %p1312_p8 = scmp.lt.s32.totalorder %s97_s15, %s97_s15 }
  0x4d   :  { %p1308_p7 = scmp.ne.s32.totalorder %s97_s15, %s1307_s23  ;;  %p1313_p9 = scmp.lt.s32.totalorder %s1307_s23, %s1307_s23 }
  0x4f   :  { %p1314_p10 = por %p1313_p9, %p1312_p8 }
  0x51   :  { %p1315_p11 = pnand %p1314_p10, %p1308_p7 }
  0x53   :  { %1318 = shalt.err (!%p1315_p11)
}
  0x54   :  { %102 = dma.hbm_to_vmem [thread:$0]  %s1572_s8, 2048, %s97_s15, [#allocation9], %s1351_s29, %s1351_s29, %s1352_s30  }
  0x55   :  { %1341 = dma.done.wait [#allocation3], 512  }
  0x56   :  { %1342 = vsyncadd [#allocation3], 4294966784 }
  0x57   :  { %1343 = dma.done.wait [#allocation6], 2304  }
  0x58   :  { %1344 = vsyncadd [#allocation6], 4294964992 }
  0x59   :  { %1345 = dma.done.wait [#allocation9], 6144  }
  0x5a   :  { %1346 = vsyncadd [#allocation9], 4294961152  ;;  %v1358_v0 = vmov 0.0|0.0   ;;  %vm1359_vm0 = vmmov 0   ;;  %v1360_v1 = vmov 0.0   ;;  %v1361_v2 = vmov 0  }
  0x5b   :  { %1112 = vmatprep.subr.bf16.mxu1 %v1358_v0  ;;  %990 = vmatprep.mubr.msk.f32.mxu1 %vm1359_vm0, %v1360_v1  ;;  %v320_v3 = vld [vmem:[#allocation2] sm:$0xff]  ;;  %v321_v4 = vld [vmem:[#allocation2 + $0x8] sm:$0xff]  ;;  %v402_v7 = vld [vmem:[#allocation2 + $0x10] sm:$0xff]  ;;  %vm327_vm1 = vcmask 130048   ;;  %vm712_vm2 = vcmask 64512   ;;  %s1362_s13 = smov [#allocation11]  }
  0x5c   :  { %1196 = vset.pattern.permute.xlu0 %v1361_v2  ;;  %307 = vmatprep.mubr.f32.mxu0 %v1360_v1  ;;  %v1113_v5 = vpack.c.bf16 %v321_v4, %v320_v3  ;;  %v162_v6 = vld [vmem:[%s1566_s2] sm:$0xff]  ;;  %v403_v8 = vld [vmem:[#allocation2 + $0x18] sm:$0xff]  ;;  %v183_v11 = vld [vmem:[#allocation8 + $0x18] sm:$0xff]  ;;  %s898_s0 = sshll.u32 %s1362_s13, 4  ;;  %s899_s0 = int_to_ptr.vmem [resolvable:$true] %s898_s0 }
  0x5d   :  { %v163_v9 = vld [vmem:[%s1567_s3] sm:$0xff]  ;;  %v181_v10 = vld [vmem:[#allocation8 + $0x8] sm:$0xff]  ;;  %v180_v12 = vld [vmem:[#allocation8] sm:$0xff]  ;;  %v1116_v13 = vpack.c.bf16 %v403_v8, %v402_v7  ;;  %p1324_p13 = scmp.lt.s32.totalorder %s899_s0, %s899_s0 }
  0x5e   :  { %324 = vperm.xlu0 %1196, %v163_v9   ;;  %1114 = vmatpush3.bf16.msra.mxu1 %v1113_v5  ;;  %v1080_v14 = vpack.c.bf16 %v183_v11, %v181_v10  ;;  %v182_v15 = vld [vmem:[#allocation8 + $0x10] sm:$0xff]  ;;  %v164_v16 = vld [vmem:[#allocation7] sm:$0xff]  ;;  %v165_v17 = vld [vmem:[#allocation7 + $0x8] sm:$0xff] }
  0x5f   :  { %1115 = vmatprep.subr.bf16.mxu1 %v1358_v0  ;;  %v1082_v18 = vpack.c.bf16 %v182_v15, %v180_v12  ;;  %v1118_v19 = vpack.c.bf16 %v165_v17, %v164_v16  ;;  %v185_v20 = vld [vmem:[#allocation8 + $0x28] sm:$0xff]  ;;  %v187_v21 = vld [vmem:[#allocation8 + $0x38] sm:$0xff]  ;;  %v184_v22 = vld [vmem:[#allocation8 + $0x20] sm:$0xff] }
  0x60   :  { %1081 = vmatprep.subr.bf16.mxu0 %v1080_v14  ;;  %v1084_v23 = vpack.c.bf16 %v187_v21, %v185_v20  ;;  %v186_v24 = vld [vmem:[#allocation8 + $0x30] sm:$0xff]  ;;  %v167_v26 = vld [vmem:[#allocation7 + $0x18] sm:$0xff]  ;;  %v189_v28 = vld [vmem:[#allocation8 + $0x48] sm:$0xff] }
  0x61   :  { %v166_v25 = vld [vmem:[#allocation7 + $0x10] sm:$0xff]  ;;  %991 = vmatmul.mubr.msk.f32.vlgmr.msra.gmra.mrb[0].mxu1 %vm327_vm1, %v162_v6  ;;  %1083 = vmatpush1.bf16.msra.mxu0 %v1082_v18  ;;  %v1086_v27 = vpack.c.bf16 %v186_v24, %v184_v22  ;;  %v191_v29 = vld [vmem:[#allocation8 + $0x58] sm:$0xff]  ;;  %v188_v31 = vld [vmem:[#allocation8 + $0x40] sm:$0xff] }
  0x62   :  { %1117 = vmatpush3.bf16.msra.mxu1 %v1116_v13  ;;  %997 = vmatprep.mubr.msk.f32.mxu1 %vm1359_vm0, %v1360_v1  ;;  %v1088_v30 = vpack.c.bf16 %v191_v29, %v189_v28  ;;  %v190_v32 = vld [vmem:[#allocation8 + $0x50] sm:$0xff]  ;;  %v1122_v33 = vpack.c.bf16 %v167_v26, %v166_v25  ;;  %v193_v34 = vld [vmem:[#allocation8 + $0x68] sm:$0xff]  ;;  %v195_v35 = vld [vmem:[#allocation8 + $0x78] sm:$0xff] }
  0x63   :  { %1119 = vmatprep.subr.bf16.mxu1 %v1118_v19  ;;  %1085 = vmatprep.subr.bf16.mxu0 %v1084_v23  ;;  %v168_v36 = vld [vmem:[#allocation7 + $0x20] sm:$0xff]  ;;  %v169_v37 = vld [vmem:[#allocation7 + $0x28] sm:$0xff]  ;;  %v1090_v38 = vpack.c.bf16 %v190_v32, %v188_v31  ;;  %v1092_v39 = vpack.c.bf16 %v195_v35, %v193_v34  ;;  %v194_v41 = vld [vmem:[#allocation8 + $0x70] sm:$0xff] }
  0x64   :  { %v192_v40 = vld [vmem:[#allocation8 + $0x60] sm:$0xff]  ;;  %v1126_v42 = vpack.c.bf16 %v169_v37, %v168_v36  ;;  %v197_v43 = vld [vmem:[#allocation8 + $0x88] sm:$0xff]  ;;  %v199_v44 = vld [vmem:[#allocation8 + $0x98] sm:$0xff] }
  0x65   :  { %998 = vmatmul.mubr.msk.f32.vlgmr.msra.gmra.mrb[2].mxu1 %vm327_vm1, %v162_v6  ;;  %1087 = vmatpush1.bf16.msra.mxu0 %v1086_v27  ;;  %v170_v45 = vld [vmem:[#allocation7 + $0x30] sm:$0xff]  ;;  %v171_v46 = vld [vmem:[#allocation7 + $0x38] sm:$0xff]  ;;  %v1094_v47 = vpack.c.bf16 %v194_v41, %v192_v40  ;;  %v1096_v48 = vpack.c.bf16 %v199_v44, %v197_v43  ;;  %v196_v49 = vld [vmem:[#allocation8 + $0x80] sm:$0xff] }
  0x66   :  { %1121 = vmatpush3.bf16.msra.mxu1 %v1118_v19  ;;  %1089 = vmatprep.subr.bf16.mxu0 %v1088_v30  ;;  %v198_v50 = vld [vmem:[#allocation8 + $0x90] sm:$0xff]  ;;  %v1130_v51 = vpack.c.bf16 %v171_v46, %v170_v45  ;;  %v201_v52 = vld [vmem:[#allocation8 + $0xa8] sm:$0xff]  ;;  %v203_v53 = vld [vmem:[#allocation8 + $0xb8] sm:$0xff] }
  0x67   :  { %1123 = vmatprep.subr.bf16.mxu1 %v1122_v33  ;;  %v172_v54 = vld [vmem:[#allocation7 + $0x40] sm:$0xff]  ;;  %v173_v55 = vld [vmem:[#allocation7 + $0x48] sm:$0xff]  ;;  %v1098_v56 = vpack.c.bf16 %v198_v50, %v196_v49  ;;  %v1100_v57 = vpack.c.bf16 %v203_v53, %v201_v52  ;;  %v202_v59 = vld [vmem:[#allocation8 + $0xb0] sm:$0xff] }
  0x68   :  { %v200_v58 = vld [vmem:[#allocation8 + $0xa0] sm:$0xff]  ;;  %v1134_v60 = vpack.c.bf16 %v173_v55, %v172_v54  ;;  %v205_v61 = vld [vmem:[#allocation8 + $0xc8] sm:$0xff]  ;;  %v207_v62 = vld [vmem:[#allocation8 + $0xd8] sm:$0xff] }
  0x69   :  { %1091 = vmatpush1.bf16.msra.mxu0 %v1090_v38  ;;  %v174_v63 = vld [vmem:[#allocation7 + $0x50] sm:$0xff]  ;;  %v175_v0 = vld [vmem:[#allocation7 + $0x58] sm:$0xff]  ;;  %v1102_v2 = vpack.c.bf16 %v202_v59, %v200_v58  ;;  %v1104_v3 = vpack.c.bf16 %v207_v62, %v205_v61  ;;  %v204_v4 = vld [vmem:[#allocation8 + $0xc0] sm:$0xff] }
  0x6a   :  { %1125 = vmatpush3.bf16.msra.mxu1 %v1122_v33  ;;  %1093 = vmatprep.subr.bf16.mxu0 %v1092_v39  ;;  %v206_v5 = vld [vmem:[#allocation8 + $0xd0] sm:$0xff]  ;;  %v1138_v6 = vpack.c.bf16 %v175_v0, %v174_v63  ;;  %v176_v7 = vld [vmem:[#allocation7 + $0x60] sm:$0xff]  ;;  %v177_v8 = vld [vmem:[#allocation7 + $0x68] sm:$0xff]  ;;  %v233_v33 = vlaneseq }
  0x6b   :  { %1127 = vmatprep.subr.bf16.mxu1 %v1126_v42  ;;  %v1106_v9 = vpack.c.bf16 %v206_v5, %v204_v4  ;;  %v1142_v10 = vpack.c.bf16 %v177_v8, %v176_v7  ;;  %v209_v11 = vld [vmem:[#allocation8 + $0xe8] sm:$0xff]  ;;  %v211_v12 = vld [vmem:[#allocation8 + $0xf8] sm:$0xff]  ;;  %v208_v14 = vld [vmem:[#allocation8 + $0xe0] sm:$0xff] }
  0x6c   :  { %v1108_v13 = vpack.c.bf16 %v211_v12, %v209_v11  ;;  %v210_v15 = vld [vmem:[#allocation8 + $0xf0] sm:$0xff]  ;;  %v179_v18 = vld [vmem:[#allocation7 + $0x78] sm:$0xff]  ;;  %v1527_v34 = vshrl.u32 %v233_v33, 7  ;;  %v212_v50 = vld [vmem:[#allocation10] sm:$0xff] }
  0x6d   :  { %1095 = vmatpush1.bf16.msra.mxu0 %v1094_v47  ;;  %v1110_v16 = vpack.c.bf16 %v210_v15, %v208_v14  ;;  %v178_v17 = vld [vmem:[#allocation7 + $0x70] sm:$0xff]  ;;  %v230_v21 = vld [vmem:[#allocation5 + $0x8] sm:$0xff]  ;;  %v220_v62 = vld [vmem:[#allocation10 + $0x40] sm:$0xff] }
  0x6e   :  { %1129 = vmatpush3.bf16.msra.mxu1 %v1126_v42  ;;  %1097 = vmatprep.subr.bf16.mxu0 %v1096_v48  ;;  %v1146_v19 = vpack.c.bf16 %v179_v18, %v178_v17  ;;  %v229_v20 = vld [vmem:[#allocation5] sm:$0xff]  ;;  %v215_v54 = vld [vmem:[#allocation10 + $0x18] sm:$0xff]  ;;  %v221_v63 = vld [vmem:[#allocation10 + $0x48] sm:$0xff] }
  0x6f   :  { %1131 = vmatprep.subr.bf16.mxu1 %v1130_v51  ;;  %v1533_v35 = vld [vmem:[%s1571_s7] sm:$0x3]  ;;  %v1166_v0 = vpack.c.bf16 %v221_v63, %v220_v62  ;;  %v224_v5 = vld [vmem:[#allocation10 + $0x60] sm:$0xff] }
  0x70   :  { %v932_v37 = vld [vmem:[%s1569_s5] ss:$0 sm:$0xff] }
  0x71   :  { %1099 = vmatpush1.bf16.msra.mxu0 %v1098_v56  ;;  %v214_v53 = vld [vmem:[#allocation10 + $0x10] sm:$0xff]  ;;  %v216_v56 = vld [vmem:[#allocation10 + $0x20] sm:$0xff] }
  0x72   :  { %1133 = vmatpush3.bf16.msra.mxu1 %v1130_v51  ;;  %1101 = vmatprep.subr.bf16.mxu0 %v1100_v57  ;;  %v213_v51 = vld [vmem:[#allocation10 + $0x8] sm:$0xff]  ;;  %v1154_v55 = vpack.c.bf16 %v215_v54, %v214_v53  ;;  %v218_v59 = vld [vmem:[#allocation10 + $0x30] sm:$0xff] }
  0x73   :  { %1135 = vmatprep.subr.bf16.mxu1 %v1134_v60  ;;  %v1150_v52 = vpack.c.bf16 %v213_v51, %v212_v50  ;;  %v217_v57 = vld [vmem:[#allocation10 + $0x28] sm:$0xff]  ;;  %v226_v8 = vld [vmem:[#allocation10 + $0x70] sm:$0xff] }
  0x74   :  { %v1158_v58 = vpack.c.bf16 %v217_v57, %v216_v56  ;;  %v228_v11 = vld [vmem:[%s1574_s10] sm:$0xff] }
  0x75   :  { %1103 = vmatpush1.bf16.msra.mxu0 %v1102_v2  ;;  %v222_v2 = vld [vmem:[#allocation10 + $0x50] sm:$0xff] }
  0x76   :  { %1137 = vmatpush3.bf16.msra.mxu1 %v1134_v60  ;;  %1105 = vmatprep.subr.bf16.mxu0 %v1104_v3  ;;  %v219_v60 = vld [vmem:[#allocation10 + $0x38] sm:$0xff] }
  0x77   :  { %1139 = vmatprep.subr.bf16.mxu1 %v1138_v6  ;;  %v1162_v61 = vpack.c.bf16 %v219_v60, %v218_v59  ;;  %v223_v3 = vld [vmem:[#allocation10 + $0x58] sm:$0xff] }
  0x78   :  { %v1170_v4 = vpack.c.bf16 %v223_v3, %v222_v2 }
  0x79   :  { %1107 = vmatpush1.bf16.msra.mxu0 %v1106_v9  ;;  %v227_v9 = vld [vmem:[#allocation10 + $0x78] sm:$0xff] }
  0x7a   :  { %1141 = vmatpush3.bf16.msra.mxu1 %v1138_v6  ;;  %1109 = vmatprep.subr.bf16.mxu0 %v1108_v13  ;;  %v225_v6 = vld [vmem:[#allocation10 + $0x68] sm:$0xff] }
  0x7b   :  { %1143 = vmatprep.subr.bf16.mxu1 %v1142_v10  ;;  %v1174_v7 = vpack.c.bf16 %v225_v6, %v224_v5 }
  0x7d   :  { %1111 = vmatpush1.bf16.msra.mxu0 %v1110_v16 }
  0x7e   :  { %1145 = vmatpush3.bf16.msra.mxu1 %v1142_v10  ;;  %1151 = vmatprep.subr.bf16.mxu0 %v1150_v52  ;;  %v1178_v10 = vpack.c.bf16 %v227_v9, %v226_v8 }
  0x7f   :  { %1147 = vmatprep.subr.bf16.mxu1 %v1146_v19 }
  0x80   :  { %308 = vmatmul.mubr.f32.vlgmr.msra.gmra.mrb[0].mxu0 %v229_v20 }
  0x81   :  { %313 = vmatprep.mubr.f32.mxu0 %v1360_v1  ;;  %v235_v1 = vsub.s32 0, %v1527_v34  ;;  %1153 = vmatpush3.bf16.msra.mxu0 %v1150_v52 }
  0x82   :  { %1149 = vmatpush3.bf16.msra.mxu1 %v1146_v19  ;;  %1155 = vmatprep.subr.bf16.mxu0 %v1154_v55 }
  0x83   :  { %v236_v36 = vrot.slane %v1533_v35, %v235_v1  ;;  %v239_v1 = vsub.s32 1, %v1527_v34 }
  0x84   :  { %314 = vmatmul.mubr.f32.gmra.mrb[2].mxu0 %v230_v21 }
  0x85   :  { %1157 = vmatpush3.bf16.msra.mxu0 %v1154_v55 }
  0x86   :  { %1159 = vmatprep.subr.bf16.mxu0 %v1158_v58 }
  0x89   :  { %1161 = vmatpush3.bf16.msra.mxu0 %v1158_v58 }
  0x8a   :  { %1163 = vmatprep.subr.bf16.mxu0 %v1162_v61 }
  0x8d   :  { %1165 = vmatpush3.bf16.msra.mxu0 %v1162_v61 }
  0x8e   :  { %1167 = vmatprep.subr.bf16.mxu0 %v1166_v0 }
  0x91   :  { %1169 = vmatpush3.bf16.msra.mxu0 %v1166_v0 }
  0x92   :  { %1171 = vmatprep.subr.bf16.mxu0 %v1170_v4 }
  0x95   :  { %1173 = vmatpush3.bf16.msra.mxu0 %v1170_v4 }
  0x96   :  { %1175 = vmatprep.subr.bf16.mxu0 %v1174_v7 }
  0x99   :  { %1177 = vmatpush3.bf16.msra.mxu0 %v1174_v7 }
  0x9a   :  { %1179 = vmatprep.subr.bf16.mxu0 %v1178_v10 }
  0x9d   :  { %1181 = vmatpush3.bf16.msra.mxu0 %v1178_v10 }
  0xdd   :  { %v325_v22 = vpop.permute.xlu0 %324 }
 0x134   :  { %v397_v23 = vpop.f32.mrb[0].mxu1 }
 0x135   :  { %v398_v24 = vadd.f32 %v397_v23, %v325_v22  ;;  %v992_v25 = vpop.f32.mrb[1].mxu1 }
 0x137   :  { %1032 = vmatprep.mubr.f32.mxu1 %v398_v24 }
 0x138   :  { %v470_v26 = vpop.f32.mrb[2].mxu1 }
 0x139   :  { %v471_v27 = vadd.f32 %v470_v26, %v325_v22  ;;  %v999_v28 = vpop.f32.mrb[3].mxu1 }
 0x13b   :  { %1033 = vmatmul.mubr.f32.vlgmr.msra.gmra.mrb[4].mxu1 %v471_v27 }
 0x153   :  { %v309_v29 = vpop.f32.mrb[0].mxu0 }
 0x154   :  { %v1523_v30 = vpop.f32.mrb[1].mxu0  ;;  %v310_v39 = vadd.f32 %v309_v29, %v236_v36 }
 0x157   :  { %v315_v31 = vpop.f32.mrb[2].mxu0 }
 0x158   :  { %v1525_v32 = vpop.f32.mrb[3].mxu0  ;;  %v316_v42 = vadd.f32 %v315_v31, %v236_v36  ;;  %v240_v36 = vrot.slane %v1533_v35, %v239_v1 }
 0x20e   :  { %v1034_v38 = vpop.f32.mrb[4].mxu1 }
 0x20f   :  { %v553_v40 = vadd.f32 %v1034_v38, %v932_v37  ;;  %v547_v41 = vpop.f32.mrb[5].mxu1  ;;  %v312_v38 = vadd.f32 %v1523_v30, %v240_v36  ;;  %v933_v30 = vld [vmem:[%s1573_s9] ss:$0 sm:$0xff]  ;;  %s1319_s9 = scalar_lea.vmem %s899_s0, 512 }
 0x210   :  { %v548_v43 = vadd.f32 %v932_v37, %v547_v41  ;;  %p1320_p12 = scmp.ne.s32.totalorder %s899_s0, %s1319_s9  ;;  %p1325_p0 = scmp.lt.s32.totalorder %s1319_s9, %s1319_s9 }
 0x211   :  { %v557_v44 = vmul.f32 0.088388346, %v553_v40 }
 0x212   :  { %v556_v45 = vmul.f32 0.088388346, %v548_v43  ;;  %p1326_p1 = por %p1325_p0, %p1324_p13 }
 0x213   :  { %v578_v46 = vmul.f32 %v557_v44, %v310_v39  ;;  %v581_v47 = vmul.f32 %v557_v44, %v316_v42 }
 0x214   :  { %v558_v48 = vmul.f32 %v556_v45, %v310_v39  ;;  %v561_v49 = vmul.f32 %v556_v45, %v316_v42  ;;  %v318_v39 = vadd.f32 %v1525_v32, %v240_v36  ;;  %p1327_p2 = pnand %p1326_p1, %p1320_p12 }
 0x215   :  { %579 = vadd.xlane.f32.xlu1 %v578_v46 }
 0x216   :  { %559 = vadd.xlane.f32.xlu0 %v558_v48 }
 0x219   :  { %562 = vadd.xlane.f32.xlu1 %v561_v49 }
 0x21d   :  { %582 = vadd.xlane.f32.xlu1 %v581_v47 }
 0x250   :  { %680 = vxpose.xlu1.b32.start.end [1/1] (short) (narrow) %v228_v11, 16 }
 0x2a2   :  { %v580_v12 = vpop.xlane.xlu1 %579 }
 0x2a3   :  { %v560_v13 = vpop.xlane.xlu0 %559 }
 0x2a6   :  { %v563_v14 = vpop.xlane.xlu1 %562 }
 0x2a7   :  { %v564_v15 = vmax.f32 %v560_v13, %v563_v14 }
 0x2a9   :  { %v565_v16 = vsub.f32 %v560_v13, %v564_v15  ;;  %v568_v17 = vsub.f32 %v563_v14, %v564_v15 }
 0x2aa   :  { %v583_v18 = vpop.xlane.xlu1 %582 }
 0x2ab   :  { %v566_v19 = vmul.f32 1.442695, %v565_v16  ;;  %v569_v20 = vmul.f32 1.442695, %v568_v17  ;;  %v584_v21 = vmax.f32 %v580_v12, %v583_v18 }
 0x2ad   :  { %1197 = vpow2.f32 %v566_v19  ;;  %v585_v22 = vsub.f32 %v580_v12, %v584_v21  ;;  %v588_v23 = vsub.f32 %v583_v18, %v584_v21 }
 0x2ae   :  { %1199 = vpow2.f32 %v569_v20 }
 0x2af   :  { %v586_v24 = vmul.f32 1.442695, %v585_v22  ;;  %v589_v25 = vmul.f32 1.442695, %v588_v23 }
 0x2b1   :  { %1201 = vpow2.f32 %v586_v24 }
 0x2b2   :  { %1203 = vpow2.f32 %v589_v25 }
 0x2b7   :  { %v1198_v26 = vpop.eup %1197 }
 0x2b8   :  { %v1200_v27 = vpop.eup %1199 }
 0x2b9   :  { %v571_v28 = vadd.f32 %v1200_v27, %v1198_v26 }
 0x2bb   :  { %v1202_v29 = vpop.eup %1201  ;;  %1205 = vrcp.f32 %v571_v28 }
 0x2bc   :  { %v1204_v31 = vpop.eup %1203 }
 0x2bd   :  { %v591_v33 = vadd.f32 %v1204_v31, %v1202_v29 }
 0x2bf   :  { %1207 = vrcp.f32 %v591_v33 }
 0x2c5   :  { %v1206_v37 = vpop.eup %1205 }
 0x2c6   :  { %v573_v40 = vmul.f32 %v1206_v37, %v1198_v26  ;;  %v575_v41 = vmul.f32 %v1206_v37, %v1200_v27 }
 0x2c8   :  { %v574_v42 = vmul.f32 %v573_v40, %v312_v38  ;;  %v576_v43 = vmul.f32 %v575_v41, %v318_v39 }
 0x2c9   :  { %v1208_v44 = vpop.eup %1207 }
 0x2ca   :  { %v593_v45 = vmul.f32 %v1208_v44, %v1202_v29  ;;  %v595_v46 = vmul.f32 %v1208_v44, %v1204_v31  ;;  %v577_v47 = vadd.f32 %v576_v43, %v574_v42 }
 0x2cc   :  { %1067 = vmatprep.mubr.f32.mxu0 %v577_v47  ;;  %v594_v48 = vmul.f32 %v593_v45, %v312_v38  ;;  %v596_v49 = vmul.f32 %v595_v46, %v318_v39 }
 0x2ce   :  { %v597_v34 = vadd.f32 %v596_v49, %v594_v48 }
 0x2d0   :  { %1068 = vmatmul.mubr.f32.vlgmr.msra.gmra.mrb[4].mxu0 %v597_v34  ;;  %v696_v50 = vpop.trf.xlu1 }
 0x2d1   :  { %1072 = vmatprep.mubr.msk.f32.mxu1 %vm712_vm2, %v696_v50 }
 0x2d4   :  { %v697_v52 = vpop.trf.xlu1 }
 0x3a3   :  { %v1069_v32 = vpop.f32.mrb[4].mxu0 }
 0x3a4   :  { %v671_v35 = vpop.f32.mrb[5].mxu0  ;;  %v677_v53 = vadd.f32 %v1069_v32, %v933_v30 }
 0x3a5   :  { %v672_v51 = vadd.f32 %v933_v30, %v671_v35 }
 0x3a7   :  { %1070 = vmatprep.subr.mxu1 %v672_v51 }
 0x3a8   :  { %1071 = vmatpush3.msra.mxu1 %v672_v51 }
 0x3a9   :  { %1073 = vmatmul.mubr.msk.f32.vlgmr.msra.gmra.mrb[6].mxu1 %vm712_vm2, %v697_v52  ;;  %1075 = vmatprep.subr.mxu1 %v677_v53 }
 0x3aa   :  { %1076 = vmatpush3.msra.mxu1 %v677_v53  ;;  %1077 = vmatprep.mubr.msk.f32.mxu1 %vm712_vm2, %v696_v50 }
 0x3ad   :  { %1078 = vmatmul.mubr.msk.f32.vlgmr.msra.gmra.mrb[8].mxu1 %vm712_vm2, %v697_v52 }
 0x47c   :  { %v1074_v54 = vpop.f32.mrb[6].mxu1 }
 0x47d   :  { %874 = vst [vmem:[#allocation11 + $0x8] sm:$0xff] %v1074_v54  ;;  %v785_v55 = vpop.f32.mrb[7].mxu1 }
 0x47e   :  { %873 = vst [vmem:[#allocation11] sm:$0xff] %v785_v55 }
 0x480   :  { %v1079_v56 = vpop.f32.mrb[8].mxu1 }
 0x481   :  { %876 = vst [vmem:[#allocation11 + $0x18] sm:$0xff] %v1079_v56  ;;  %v860_v57 = vpop.f32.mrb[9].mxu1 }
 0x482   :  { %875 = vst [vmem:[#allocation11 + $0x10] sm:$0xff] %v860_v57 }
 0x483   :  { %1330 = shalt.err (!%p1327_p2)
}
 0x484   :  { %s1331_s15 = scalar_lea.hbm %s1575_s11, 512 }
 0x485   :  { %p1332_p3 = scmp.ne.s32.totalorder %s1575_s11, %s1331_s15  ;;  %p1335_p4 = scmp.lt.u32.totalorder %s1331_s15, %s1575_s11 }
 0x487   :  { %p1337_p5 = pnand %p1335_p4, %p1332_p3 }
 0x489   :  { %1340 = shalt.err (!%p1337_p5)
}
 0x48a   :  { %904 = dma.vmem_to_hbm [thread:$0]  %s899_s0, 512, %s1575_s11, [#allocation4], %s1351_s29, %s1351_s29, %s1352_s30  }
 0x48b   :  { %1347 = dma.done.wait [#allocation4], 512  }
 0x48c   :  { %1348 = vsyncadd [#allocation4], 4294966784 }
 0x48d   :  { %908 = vsyncpa [#allocation3], 1 }
 0x48e   :  { %909 = vsyncpa [#allocation6], 1 }
 0x48f   :  { %910 = vsyncpa [#allocation9], 1 }
 0x490   :  { %911 = vsyncpa [#allocation4], 1 }

</bundles_post_ra>
